<compile_context>
chip_gen: v5e
topology: v5e:2x2
jax: 0.10.0
libtpu: 0.0.40
codegen_flags: <defaults>
</compile_context>

<pallas_src>
import jax
import jax.numpy as jnp
from jax import lax
from jax.experimental import pallas as pl
from jax.experimental.pallas import tpu as pltpu

DEPTH = 3   # CMPN message-passing depth
LANE = 128  # TPU lane width


def _round_up(v, m):
    return ((v + m - 1) // m) * m


def _make_kernel(tb, n, hp, depth):
    """Kernel processing `tb` molecules (tb * n atom rows) per grid step."""
    tbn = tb * n

    def kernel(cnt_ref, x_ref, a_ref, wi_ref, wh_ref, wo_ref, wg_ref, bg_ref,
               y_ref, h_ref):
        x = x_ref[0]            # (tbn, F)     bf16
        a = a_ref[...]          # (tb, n, n)   f32 compact per-molecule adjacency
        wi = wi_ref[...]        # (F,  HP)     bf16
        wh = wh_ref[...]        # (HP, HP)     bf16
        wo = wo_ref[...]        # (HP, HP)     bf16
        wg = wg_ref[...]        # (HP, OP)     bf16
        bg = bg_ref[...]        # (1,  OP)     f32
        cnt = cnt_ref[...]      # (tb, 1)      f32 per-molecule atom counts

        # W_i input projection + ReLU (f32 accumulation); tbn-row MXU GEMM.
        h0 = jnp.maximum(
            jnp.dot(x, wi, preferred_element_type=jnp.float32), 0.0)

        # depth message-passing steps, statically unrolled:
        #   h <- relu(h0 + (A @ h) @ W_h)
        # A@h uses the compact adjacency as a batched contraction (f32),
        # W_h is one 2D (tbn, HP) x (HP, HP) MXU GEMM (bf16 operands).
        h = h0
        for _ in range(depth):
            msg = jnp.einsum("jab,jbh->jah", a, h.reshape(tb, n, hp),
                             preferred_element_type=jnp.float32)
            msg = msg.reshape(tbn, hp)
            h = jnp.maximum(
                h0 + jnp.dot(msg.astype(jnp.bfloat16), wh,
                             preferred_element_type=jnp.float32), 0.0)

        # W_o atom-level output transform + ReLU.
        h = jnp.maximum(
            jnp.dot(h.astype(jnp.bfloat16), wo,
                    preferred_element_type=jnp.float32), 0.0)

        # Masked-mean readout folded into one segment matrix:
        #   seg[j, i] = 1/max(c_j, 1)  if atom i is a real atom of molecule j
        #             = 0              otherwise
        #   mol = seg @ h   (single MXU GEMM; no separate mask-mul / divide)
        col = lax.broadcasted_iota(jnp.int32, (tb, tbn), 1)   # global atom idx
        rowg = lax.broadcasted_iota(jnp.int32, (tb, tbn), 0)  # molecule idx
        local = col - rowg * n
        in_block = (local >= 0) & (local < n)
        valid = in_block & (local.astype(jnp.float32) < cnt)  # bcast (tb,1)
        inv = pl.reciprocal(jnp.clip(cnt, 1.0, float(n)), approx=True)
        seg = jnp.where(valid, inv, 0.0)                       # (tb, tbn) f32

        mol = jnp.dot(seg, h, preferred_element_type=jnp.float32)  # (tb, HP)

        # Generator head: linear HP -> OP (padded lanes stay zero).
        y = jnp.dot(mol.astype(jnp.bfloat16), wg,
                    preferred_element_type=jnp.float32) + bg

        y_ref[...] = y.astype(y_ref.dtype)    # (tb, OP) lane-dense store
        h_ref[...] = mol.astype(h_ref.dtype)  # (tb, HP) lane-dense store

    return kernel


def kano_gas_only(x, adj, n_atoms, params, out_both=True, tb=16):
    """x:(B,N,F) f32, adj:(B,N,N) row-normalized f32, n_atoms:(B,) int.

    Padded atom rows of x and adjacency rows/columns to padded atoms must be
    zero (they are produced that way by the dense-graph featurizer).
    """
    B, N, F = x.shape
    H = params["W_i"].shape[1]
    O = params["W_gen"].shape[1]
    # H=64 -> HP=128 wastes 2x MXU FLOPs on W_h/W_o; accepted (outputs must be
    # 128-lane-dense anyway; disappears if the production model uses H >= 128).
    HP = _round_up(max(H, LANE), LANE)
    OP = _round_up(max(O, LANE), LANE)

    # Pad batch to a multiple of tb (padded molecules have 0 atoms).
    G = pl.cdiv(B, tb)
    Bp = G * tb
    if Bp != B:
        pad = Bp - B
        x = jnp.pad(x, ((0, pad), (0, 0), (0, 0)))
        adj = jnp.pad(adj, ((0, pad), (0, 0), (0, 0)))
        n_atoms = jnp.pad(n_atoms, (0, pad))

    TBN = tb * N

    # Compact inputs: tb molecules per grid step; adjacency stays (Bp, N, N)
    # f32 (tiny once compact, keeps message-passing numerics in f32).
    xg = x.reshape(G, TBN, F).astype(jnp.bfloat16)
    adj_c = adj.astype(jnp.float32)
    counts = jnp.maximum(n_atoms, 0).astype(jnp.float32).reshape(Bp, 1)

    # Lane-pad weights to multiples of 128; matmul operands in bf16.
    def _pad2(w, r, c):
        return jnp.zeros((r, c), jnp.float32).at[:w.shape[0], :w.shape[1]].set(w)

    wi = _pad2(params["W_i"], F, HP).astype(jnp.bfloat16)
    wh = _pad2(params["W_h"], HP, HP).astype(jnp.bfloat16)
    wo = _pad2(params["W_o"], HP, HP).astype(jnp.bfloat16)
    wg = _pad2(params["W_gen"], HP, OP).astype(jnp.bfloat16)
    bg = _pad2(params["b_gen"], 1, OP)

    kernel = _make_kernel(tb, N, HP, DEPTH)

    flops = (2 * Bp * N * F * HP
             + DEPTH * (2 * Bp * N * N * HP + 2 * Bp * N * HP * HP)
             + 2 * Bp * N * HP * HP
             + 2 * Bp * TBN * HP
             + 2 * Bp * HP * OP)
    bytes_accessed = (xg.size * 2 + adj_c.size * 4 + counts.size * 4
                      + (wi.size + wh.size + wo.size + wg.size) * 2
                      + bg.size * 4 + Bp * (OP + HP) * 4)

    grid_spec = pltpu.PrefetchScalarGridSpec(
        num_scalar_prefetch=0,
        grid=(G,),
        in_specs=[
            pl.BlockSpec((tb, 1), lambda g: (g, 0)),          # atom counts
            pl.BlockSpec((1, TBN, F), lambda g: (g, 0, 0)),   # X tile (flat)
            pl.BlockSpec((tb, N, N), lambda g: (g, 0, 0)),    # compact adjacency
            pl.BlockSpec((F, HP), lambda g: (0, 0)),          # W_i
            pl.BlockSpec((HP, HP), lambda g: (0, 0)),         # W_h
            pl.BlockSpec((HP, HP), lambda g: (0, 0)),         # W_o
            pl.BlockSpec((HP, OP), lambda g: (0, 0)),         # W_gen
            pl.BlockSpec((1, OP), lambda g: (0, 0)),          # b_gen
        ],
        out_specs=[
            pl.BlockSpec((tb, OP), lambda g: (g, 0)),         # generator(h)
            pl.BlockSpec((tb, HP), lambda g: (g, 0)),         # h
        ],
    )

    y, h = pl.pallas_call(
        kernel,
        out_shape=(jax.ShapeDtypeStruct((Bp, OP), jnp.float32),
                   jax.ShapeDtypeStruct((Bp, HP), jnp.float32)),
        grid_spec=grid_spec,
        compiler_params=pltpu.CompilerParams(
            dimension_semantics=("parallel",),       # megacore-shardable batch
            vmem_limit_bytes=32 * 1024 * 1024),
        cost_estimate=pl.CostEstimate(flops=flops, transcendentals=0,
                                      bytes_accessed=bytes_accessed),
    )(counts, xg, adj_c, wi, wh, wo, wg, bg)

    y = y[:B, :O]
    h = h[:B, :H]
    if out_both:
        return y, h
    return y


def _reference(x, adj, mask, params):
    """Pure-JAX f32 reference of the same math, for correctness checking."""
    h0 = jax.nn.relu(jnp.einsum("bnf,fh->bnh", x, params["W_i"]))
    h = h0
    for _ in range(DEPTH):
        msg = jnp.einsum("bnm,bmh->bnh", adj, h)
        h = jax.nn.relu(h0 + jnp.einsum("bnh,hk->bnk", msg, params["W_h"]))
    h = jax.nn.relu(jnp.einsum("bnh,hk->bnk", h, params["W_o"]))
    h = h * mask
    denom = jnp.maximum(jnp.sum(mask, axis=1), 1.0)            # (B, 1)
    mol = jnp.sum(h, axis=1) / denom                           # (B, H)
    y = mol @ params["W_gen"] + params["b_gen"]                # (B, O)
    return y, mol


if __name__ == "__main__":
    key = jax.random.PRNGKey(0)
    B, N, F, H, O = 32, 16, 32, 64, 8
    ks = jax.random.split(key, 8)

    # per-molecule atom counts; padded atoms are zeroed
    n_atoms = jax.random.randint(ks[7], (B,), 4, N + 1)
    atom_idx = jnp.arange(N)[None, :]
    mask = (atom_idx < n_atoms[:, None]).astype(jnp.float32)[..., None]  # (B,N,1)
    x = jax.random.normal(ks[0], (B, N, F), jnp.float32) * mask

    # symmetric, masked, row-normalized adjacency (no self loops)
    raw = jax.random.uniform(ks[1], (B, N, N))
    adj = (((raw + jnp.swapaxes(raw, 1, 2)) * 0.5) < 0.3).astype(jnp.float32)
    adj = adj * (1.0 - jnp.eye(N, dtype=jnp.float32))
    adj = adj * mask * jnp.swapaxes(mask, 1, 2)
    adj = adj / jnp.maximum(adj.sum(-1, keepdims=True), 1.0)

    params = {
        "W_i":   0.1 * jax.random.normal(ks[2], (F, H), jnp.float32),
        "W_h":   0.1 * jax.random.normal(ks[3], (H, H), jnp.float32),
        "W_o":   0.1 * jax.random.normal(ks[4], (H, H), jnp.float32),
        "W_gen": 0.1 * jax.random.normal(ks[5], (H, O), jnp.float32),
        "b_gen": 0.01 * jax.random.normal(ks[6], (1, O), jnp.float32),
    }

    y, h = kano_gas_only(x, adj, n_atoms, params, out_both=True, tb=16)
    jax.block_until_ready((y, h))

    y_ref, h_ref = _reference(x, adj, mask, params)
    assert jnp.allclose(y, y_ref, atol=5e-2, rtol=5e-2), float(
        jnp.max(jnp.abs(y - y_ref)))
    assert jnp.allclose(h, h_ref, atol=5e-2, rtol=5e-2), float(
        jnp.max(jnp.abs(h - h_ref)))

    print("KERNEL_OK")
</pallas_src>

<mosaic_0001>
module attributes {stable_mosaic.version = 11 : i64} {
  func.func @kernel(%arg0: i32, %arg1: memref<16x1xf32, #tpu.memory_space<vmem>>, %arg2: memref<1x256x32xbf16, #tpu.memory_space<vmem>>, %arg3: memref<16x16x16xf32, #tpu.memory_space<vmem>>, %arg4: memref<32x128xbf16, #tpu.memory_space<vmem>>, %arg5: memref<128x128xbf16, #tpu.memory_space<vmem>>, %arg6: memref<128x128xbf16, #tpu.memory_space<vmem>>, %arg7: memref<128x128xbf16, #tpu.memory_space<vmem>>, %arg8: memref<1x128xf32, #tpu.memory_space<vmem>>, %arg9: memref<16x128xf32, #tpu.memory_space<vmem>>, %arg10: memref<16x128xf32, #tpu.memory_space<vmem>>) attributes {dimension_semantics = [#tpu.dimension_semantics<parallel>], iteration_bounds = array<i64: 2>, scalar_prefetch = 0 : i64, scratch_operands = 0 : i64, tpu.core_type = #tpu.core_type<tc>, window_params = [{transform_indices = @transform_0, window_bounds = array<i64: 16, 1>}, {transform_indices = @transform_1, window_bounds = array<i64: 1, 256, 32>}, {transform_indices = @transform_2, window_bounds = array<i64: 16, 16, 16>}, {pipeline_mode = #tpu.pipeline_mode<synchronous>, transform_indices = @transform_3, window_bounds = array<i64: 32, 128>}, {pipeline_mode = #tpu.pipeline_mode<synchronous>, transform_indices = @transform_4, window_bounds = array<i64: 128, 128>}, {pipeline_mode = #tpu.pipeline_mode<synchronous>, transform_indices = @transform_5, window_bounds = array<i64: 128, 128>}, {pipeline_mode = #tpu.pipeline_mode<synchronous>, transform_indices = @transform_6, window_bounds = array<i64: 128, 128>}, {pipeline_mode = #tpu.pipeline_mode<synchronous>, transform_indices = @transform_7, window_bounds = array<i64: 1, 128>}, {transform_indices = @transform_8, window_bounds = array<i64: 16, 128>}, {transform_indices = @transform_9, window_bounds = array<i64: 16, 128>}]} {
    %c0 = arith.constant 0 : index
    %c0_0 = arith.constant 0 : index
    %c0_1 = arith.constant 0 : index
    %0 = vector.load %arg2[%c0, %c0_0, %c0_1] : memref<1x256x32xbf16, #tpu.memory_space<vmem>>, vector<1x256x32xbf16>
    %1 = vector.shape_cast %0 : vector<1x256x32xbf16> to vector<256x32xbf16>
    %c0_2 = arith.constant 0 : index
    %c0_3 = arith.constant 0 : index
    %c0_4 = arith.constant 0 : index
    %2 = vector.load %arg3[%c0_2, %c0_3, %c0_4] : memref<16x16x16xf32, #tpu.memory_space<vmem>>, vector<16x16x16xf32>
    %c0_5 = arith.constant 0 : index
    %c0_6 = arith.constant 0 : index
    %3 = vector.load %arg4[%c0_5, %c0_6] : memref<32x128xbf16, #tpu.memory_space<vmem>>, vector<32x128xbf16>
    %c0_7 = arith.constant 0 : index
    %c0_8 = arith.constant 0 : index
    %4 = vector.load %arg5[%c0_7, %c0_8] : memref<128x128xbf16, #tpu.memory_space<vmem>>, vector<128x128xbf16>
    %c0_9 = arith.constant 0 : index
    %c0_10 = arith.constant 0 : index
    %5 = vector.load %arg6[%c0_9, %c0_10] : memref<128x128xbf16, #tpu.memory_space<vmem>>, vector<128x128xbf16>
    %c0_11 = arith.constant 0 : index
    %c0_12 = arith.constant 0 : index
    %6 = vector.load %arg7[%c0_11, %c0_12] : memref<128x128xbf16, #tpu.memory_space<vmem>>, vector<128x128xbf16>
    %c0_13 = arith.constant 0 : index
    %c0_14 = arith.constant 0 : index
    %7 = vector.load %arg8[%c0_13, %c0_14] : memref<1x128xf32, #tpu.memory_space<vmem>>, vector<1x128xf32>
    %c0_15 = arith.constant 0 : index
    %c0_16 = arith.constant 0 : index
    %8 = vector.load %arg1[%c0_15, %c0_16] : memref<16x1xf32, #tpu.memory_space<vmem>>, vector<16x1xf32>
    %cst = arith.constant dense<0.000000e+00> : vector<256x128xf32>
    %9 = tpu.matmul %1, %3, %cst {dimension_numbers = #tpu.dot_dimension_numbers<[1], [0], [0], [1], [0, 0, 1, 1], [], []>} : vector<256x32xbf16>, vector<32x128xbf16>, vector<256x128xf32> -> vector<256x128xf32>
    %cst_17 = arith.constant 0.000000e+00 : f32
    %10 = vector.broadcast %cst_17 : f32 to vector<256x128xf32>
    %11 = arith.maximumf %9, %10 : vector<256x128xf32>
    %12 = vector.shape_cast %11 : vector<256x128xf32> to vector<16x16x128xf32>
    "tpu.trace_start"() <{level = 10 : i32, message = "jab,jbh->jah"}> : () -> ()
    %cst_18 = arith.constant dense<0.000000e+00> : vector<16x16x128xf32>
    %13 = tpu.matmul %2, %12, %cst_18 {dimension_numbers = #tpu.dot_dimension_numbers<[2], [1], [1], [2], [0, 0, 0, 1, 1, 2], [0], [0]>} : vector<16x16x16xf32>, vector<16x16x128xf32>, vector<16x16x128xf32> -> vector<16x16x128xf32>
    "tpu.trace_stop"() : () -> ()
    %14 = vector.shape_cast %13 : vector<16x16x128xf32> to vector<256x128xf32>
    %15 = arith.truncf %14 : vector<256x128xf32> to vector<256x128xbf16>
    %cst_19 = arith.constant dense<0.000000e+00> : vector<256x128xf32>
    %16 = tpu.matmul %15, %4, %cst_19 {dimension_numbers = #tpu.dot_dimension_numbers<[1], [0], [0], [1], [0, 0, 1, 1], [], []>} : vector<256x128xbf16>, vector<128x128xbf16>, vector<256x128xf32> -> vector<256x128xf32>
    %17 = arith.addf %11, %16 : vector<256x128xf32>
    %cst_20 = arith.constant 0.000000e+00 : f32
    %18 = vector.broadcast %cst_20 : f32 to vector<256x128xf32>
    %19 = arith.maximumf %17, %18 : vector<256x128xf32>
    %20 = vector.shape_cast %19 : vector<256x128xf32> to vector<16x16x128xf32>
    "tpu.trace_start"() <{level = 10 : i32, message = "jab,jbh->jah"}> : () -> ()
    %cst_21 = arith.constant dense<0.000000e+00> : vector<16x16x128xf32>
    %21 = tpu.matmul %2, %20, %cst_21 {dimension_numbers = #tpu.dot_dimension_numbers<[2], [1], [1], [2], [0, 0, 0, 1, 1, 2], [0], [0]>} : vector<16x16x16xf32>, vector<16x16x128xf32>, vector<16x16x128xf32> -> vector<16x16x128xf32>
    "tpu.trace_stop"() : () -> ()
    %22 = vector.shape_cast %21 : vector<16x16x128xf32> to vector<256x128xf32>
    %23 = arith.truncf %22 : vector<256x128xf32> to vector<256x128xbf16>
    %cst_22 = arith.constant dense<0.000000e+00> : vector<256x128xf32>
    %24 = tpu.matmul %23, %4, %cst_22 {dimension_numbers = #tpu.dot_dimension_numbers<[1], [0], [0], [1], [0, 0, 1, 1], [], []>} : vector<256x128xbf16>, vector<128x128xbf16>, vector<256x128xf32> -> vector<256x128xf32>
    %25 = arith.addf %11, %24 : vector<256x128xf32>
    %cst_23 = arith.constant 0.000000e+00 : f32
    %26 = vector.broadcast %cst_23 : f32 to vector<256x128xf32>
    %27 = arith.maximumf %25, %26 : vector<256x128xf32>
    %28 = vector.shape_cast %27 : vector<256x128xf32> to vector<16x16x128xf32>
    "tpu.trace_start"() <{level = 10 : i32, message = "jab,jbh->jah"}> : () -> ()
    %cst_24 = arith.constant dense<0.000000e+00> : vector<16x16x128xf32>
    %29 = tpu.matmul %2, %28, %cst_24 {dimension_numbers = #tpu.dot_dimension_numbers<[2], [1], [1], [2], [0, 0, 0, 1, 1, 2], [0], [0]>} : vector<16x16x16xf32>, vector<16x16x128xf32>, vector<16x16x128xf32> -> vector<16x16x128xf32>
    "tpu.trace_stop"() : () -> ()
    %30 = vector.shape_cast %29 : vector<16x16x128xf32> to vector<256x128xf32>
    %31 = arith.truncf %30 : vector<256x128xf32> to vector<256x128xbf16>
    %cst_25 = arith.constant dense<0.000000e+00> : vector<256x128xf32>
    %32 = tpu.matmul %31, %4, %cst_25 {dimension_numbers = #tpu.dot_dimension_numbers<[1], [0], [0], [1], [0, 0, 1, 1], [], []>} : vector<256x128xbf16>, vector<128x128xbf16>, vector<256x128xf32> -> vector<256x128xf32>
    %33 = arith.addf %11, %32 : vector<256x128xf32>
    %cst_26 = arith.constant 0.000000e+00 : f32
    %34 = vector.broadcast %cst_26 : f32 to vector<256x128xf32>
    %35 = arith.maximumf %33, %34 : vector<256x128xf32>
    %36 = arith.truncf %35 : vector<256x128xf32> to vector<256x128xbf16>
    %cst_27 = arith.constant dense<0.000000e+00> : vector<256x128xf32>
    %37 = tpu.matmul %36, %5, %cst_27 {dimension_numbers = #tpu.dot_dimension_numbers<[1], [0], [0], [1], [0, 0, 1, 1], [], []>} : vector<256x128xbf16>, vector<128x128xbf16>, vector<256x128xf32> -> vector<256x128xf32>
    %cst_28 = arith.constant 0.000000e+00 : f32
    %38 = vector.broadcast %cst_28 : f32 to vector<256x128xf32>
    %39 = arith.maximumf %37, %38 : vector<256x128xf32>
    %40 = tpu.iota {dimensions = array<i32: 1>} : vector<16x256xi32>
    %41 = tpu.iota {dimensions = array<i32: 0>} : vector<16x256xi32>
    %c16_i32 = arith.constant 16 : i32
    %42 = vector.broadcast %c16_i32 : i32 to vector<16x256xi32>
    %43 = arith.muli %41, %42 : vector<16x256xi32>
    %44 = arith.subi %40, %43 : vector<16x256xi32>
    %c0_i32 = arith.constant 0 : i32
    %45 = vector.broadcast %c0_i32 : i32 to vector<16x256xi32>
    %46 = arith.cmpi sge, %44, %45 : vector<16x256xi32>
    %c16_i32_29 = arith.constant 16 : i32
    %47 = vector.broadcast %c16_i32_29 : i32 to vector<16x256xi32>
    %48 = arith.cmpi slt, %44, %47 : vector<16x256xi32>
    %49 = arith.andi %46, %48 : vector<16x256xi1>
    %50 = arith.sitofp %44 : vector<16x256xi32> to vector<16x256xf32>
    %51 = vector.broadcast %8 : vector<16x1xf32> to vector<16x256xf32>
    %52 = arith.cmpf olt, %50, %51 : vector<16x256xf32>
    %53 = arith.andi %49, %52 : vector<16x256xi1>
    %cst_30 = arith.constant 1.000000e+00 : f32
    %cst_31 = arith.constant 1.600000e+01 : f32
    %54 = vector.broadcast %cst_30 : f32 to vector<16x1xf32>
    %55 = arith.maximumf %54, %8 : vector<16x1xf32>
    %56 = vector.broadcast %cst_31 : f32 to vector<16x1xf32>
    %57 = arith.minimumf %56, %55 : vector<16x1xf32>
    %58 = tpu.reciprocal %57 {approx = true} : vector<16x1xf32> -> vector<16x1xf32>
    %cst_32 = arith.constant 0.000000e+00 : f32
    %59 = vector.shape_cast %58 : vector<16x1xf32> to vector<16x1xf32>
    %60 = vector.broadcast %59 : vector<16x1xf32> to vector<16x256xf32>
    %61 = vector.broadcast %cst_32 : f32 to vector<16x256xf32>
    %62 = arith.select %53, %60, %61 : vector<16x256xi1>, vector<16x256xf32>
    %cst_33 = arith.constant dense<0.000000e+00> : vector<16x128xf32>
    %63 = tpu.matmul %62, %39, %cst_33 {dimension_numbers = #tpu.dot_dimension_numbers<[1], [0], [0], [1], [0, 0, 1, 1], [], []>} : vector<16x256xf32>, vector<256x128xf32>, vector<16x128xf32> -> vector<16x128xf32>
    %64 = arith.truncf %63 : vector<16x128xf32> to vector<16x128xbf16>
    %cst_34 = arith.constant dense<0.000000e+00> : vector<16x128xf32>
    %65 = tpu.matmul %64, %6, %cst_34 {dimension_numbers = #tpu.dot_dimension_numbers<[1], [0], [0], [1], [0, 0, 1, 1], [], []>} : vector<16x128xbf16>, vector<128x128xbf16>, vector<16x128xf32> -> vector<16x128xf32>
    %66 = vector.broadcast %7 : vector<1x128xf32> to vector<16x128xf32>
    %67 = arith.addf %65, %66 : vector<16x128xf32>
    %c0_35 = arith.constant 0 : index
    %c0_36 = arith.constant 0 : index
    %68 = vector.load %arg9[%c0_35, %c0_36] : memref<16x128xf32, #tpu.memory_space<vmem>>, vector<16x128xf32>
    tpu.vector_store %arg9[%c0_35, %c0_36], %67 {strides = array<i32>} : memref<16x128xf32, #tpu.memory_space<vmem>>, vector<16x128xf32>,
    %c0_37 = arith.constant 0 : index
    %c0_38 = arith.constant 0 : index
    %69 = vector.load %arg10[%c0_37, %c0_38] : memref<16x128xf32, #tpu.memory_space<vmem>>, vector<16x128xf32>
    tpu.vector_store %arg10[%c0_37, %c0_38], %63 {strides = array<i32>} : memref<16x128xf32, #tpu.memory_space<vmem>>, vector<16x128xf32>,
    return
  }
  func.func @transform_0(%arg0: i32) -> (i32, i32) {
    %c0_i32 = arith.constant 0 : i32
    %c0_i32_0 = arith.constant 0 : i32
    return %arg0, %c0_i32 : i32, i32
  }
  func.func @transform_1(%arg0: i32) -> (i32, i32, i32) {
    %c0_i32 = arith.constant 0 : i32
    %c0_i32_0 = arith.constant 0 : i32
    %c0_i32_1 = arith.constant 0 : i32
    return %arg0, %c0_i32, %c0_i32_0 : i32, i32, i32
  }
  func.func @transform_2(%arg0: i32) -> (i32, i32, i32) {
    %c0_i32 = arith.constant 0 : i32
    %c0_i32_0 = arith.constant 0 : i32
    %c0_i32_1 = arith.constant 0 : i32
    return %arg0, %c0_i32, %c0_i32_0 : i32, i32, i32
  }
  func.func @transform_3(%arg0: i32) -> (i32, i32) {
    %c0_i32 = arith.constant 0 : i32
    %c0_i32_0 = arith.constant 0 : i32
    %c0_i32_1 = arith.constant 0 : i32
    return %c0_i32, %c0_i32_0 : i32, i32
  }
  func.func @transform_4(%arg0: i32) -> (i32, i32) {
    %c0_i32 = arith.constant 0 : i32
    %c0_i32_0 = arith.constant 0 : i32
    %c0_i32_1 = arith.constant 0 : i32
    return %c0_i32, %c0_i32_0 : i32, i32
  }
  func.func @transform_5(%arg0: i32) -> (i32, i32) {
    %c0_i32 = arith.constant 0 : i32
    %c0_i32_0 = arith.constant 0 : i32
    %c0_i32_1 = arith.constant 0 : i32
    return %c0_i32, %c0_i32_0 : i32, i32
  }
  func.func @transform_6(%arg0: i32) -> (i32, i32) {
    %c0_i32 = arith.constant 0 : i32
    %c0_i32_0 = arith.constant 0 : i32
    %c0_i32_1 = arith.constant 0 : i32
    return %c0_i32, %c0_i32_0 : i32, i32
  }
  func.func @transform_7(%arg0: i32) -> (i32, i32) {
    %c0_i32 = arith.constant 0 : i32
    %c0_i32_0 = arith.constant 0 : i32
    %c0_i32_1 = arith.constant 0 : i32
    return %c0_i32, %c0_i32_0 : i32, i32
  }
  func.func @transform_8(%arg0: i32) -> (i32, i32) {
    %c0_i32 = arith.constant 0 : i32
    %c0_i32_0 = arith.constant 0 : i32
    return %arg0, %c0_i32 : i32, i32
  }
  func.func @transform_9(%arg0: i32) -> (i32, i32) {
    %c0_i32 = arith.constant 0 : i32
    %c0_i32_0 = arith.constant 0 : i32
    return %arg0, %c0_i32 : i32, i32
  }
}

</mosaic_0001>

<bundles_post_ra>
// kernel: tpu_custom_call.1
= control target key start
LH: loop header
LB: loop body
LE: loop exit
PB: predicated region body
PF: predicated region fallthrough
CT: control target
= control target key end

     0   :  { %s4448_s0 = inlined_call_operand.vmem [shape: f32[32,1], index: 0, kind: input, shape index: {}]   ;;  %s4449_s1 = inlined_call_operand.vmem [shape: bf16[2,256,32], index: 1, kind: input, shape index: {}]   ;;  %s4450_s2 = inlined_call_operand.vmem [shape: f32[32,16,16], index: 2, kind: input, shape index: {}]   ;;  %s4451_s3 = inlined_call_operand.vmem [shape: bf16[32,128], index: 3, kind: input, shape index: {}]   ;;  %s4452_s4 = inlined_call_operand.vmem [shape: bf16[128,128], index: 4, kind: input, shape index: {}]   ;;  %s4453_s5 = inlined_call_operand.vmem [shape: bf16[128,128], index: 5, kind: input, shape index: {}]   ;;  %s4454_s6 = inlined_call_operand.vmem [shape: bf16[128,128], index: 6, kind: input, shape index: {}]   ;;  %s4455_s7 = inlined_call_operand.vmem [shape: f32[1,128], index: 7, kind: input, shape index: {}]   ;;  %s4456_s8 = inlined_call_operand.hbm [shape: f32[32,128], index: 8, kind: output, shape index: {0}]   ;;  %s4457_s9 = inlined_call_operand.hbm [shape: f32[32,128], index: 9, kind: output, shape index: {1}]  }
   0x1   :  { %4519 = sst [smem:[#allocation39_spill]] %s4448_s0 }
   0x2   :  { %4520 = sst [smem:[#allocation40_spill]] %s4449_s1 }
   0x3   :  { %4521 = sst [smem:[#allocation41_spill]] %s4450_s2 }
   0x4   :  { %15 = vsyncpa [#allocation3], 0 }
   0x5   :  { %17 = vsyncpa [#allocation3 + $0x1], 0 }
   0x6   :  { %18 = vsyncpa [#allocation5], 0 }
   0x7   :  { %20 = vsyncpa [#allocation5 + $0x1], 0  ;;  %s3621_s30 = smov 0   ;;  %s3623_s10 = smov 0  }
   0x8   :  { %s3625_s11 = smov 0   ;;  %s3627_s12 = smov 0  }
   0x9 LB: > { %s3642_s13 = sadd.s32 4294967295, %s3566_s12   ;;  %s3053_s14 = sadd.s32 4294967294, %s3566_s12   ;;  %s3566_s12 = sphi %s3627_s12, %s4619_s12   ;;  %s3562_s11 = sphi %s3625_s11, %s4618_s11   ;;  %s3558_s10 = sphi %s3623_s10, %s4617_s10   ;;  %s3554_s30 = sphi %s3621_s30, %s4616_s30  }
   0xa   : > { %s3646_s15 = sadd.s32 1, %s3566_s12   ;;  %s216_s16 = sadd.s32 1, %s3562_s11 }
   0xb   : > { %s213_s17 = ssub.s32 %s3566_s12, %s3646_s15  ;;  %p226_p0 = scmp.ne.s32.totalorder %s3562_s11, %s3558_s10 }
   0xc   : > { %p214_p1 = scmp.eq.s32.totalorder %s213_s17, 0  ;;  %p227_p2 = scmp.eq.s32.totalorder %s3642_s13, 1 }
   0xd   : > { %p232_p3 = scmp.ne.s32.totalorder %s3558_s10, %s3554_s30  ;;  %p233_p4 = scmp.eq.s32.totalorder %s3053_s14, 1 }
   0xe   : > { %s3657_s18 = scalar_select %p214_p1, %s3562_s11, %s216_s16  }
   0xf   : > { %p3659_p5 = por %p227_p2, %p226_p0  ;;  %p3663_p6 = por %p233_p4, %p232_p3 }
  0x10   : > { %p3056_p7 = scmp.ge.s32.totalorder %s3566_s12, 1  ;;  %p319_p8 = scmp.lt.s32.totalorder %s3566_s12, 3 }
  0x12   : > { %p320_p9 = pnand %p3056_p7, %p319_p8 }
  0x14   : > { %323 = sbr.rel (%p320_p9) target bundleno = 2000 (0x7d0), region = 52 }
  0x19   : > { %v3377_v0 = vld [vmem:[%s4451_s3 + $0x8] sm:$0xff]  ;;  %p377_p10 = scmp.lt.s32.totalorder %s3642_s13, 1  ;;  %v3376_v1 = vld [vmem:[%s4451_s3] sm:$0xff]  ;;  %s4524_s1 = sld [smem:[#allocation40_spill]]  ;;  %vm603_vm0 = vcmask 261120   ;;  %vm773_vm1 = vcmask 130048  }
  0x1a   : > { %658 = vmatpush.bf16.msra.mxu0 %v3377_v0  ;;  %3404 = vmatpush.bf16.msra.mxu3 %v3377_v0  ;;  %s3719_s14 = sshll.u32 %s3642_s13, 4  ;;  %s4525_s2 = sld [smem:[#allocation41_spill]] }
  0x1b   : > { %s378_s25 = scalar_select %p377_p10, %s3642_s13, 1 }
  0x1c   : > { %p383_p11 = scmp.lt.s32.totalorder %s3719_s14, 31  ;;  %s3059_s24 = sshll.u32 %s3642_s13, 1 }
  0x1d   : > { %s3358_s26 = sshll.u32 %s378_s25, 7  ;;  %p372_p12 = scmp.lt.s32.totalorder %s3059_s24, 3 }
  0x1e   : > { %659 = vmatpush.bf16.msra.mxu0 %v3376_v1  ;;  %3405 = vmatpush.bf16.msra.mxu3 %v3376_v1  ;;  %s384_s16 = scalar_select %p383_p11, %s3719_s14, 31 }
  0x1f   : > { %s3680_s29 = scalar_lea.vmem %s4524_s1, %s3358_s26  ;;  %s4621_s24 = smov (!%p372_p12, %s3059_s24), 3 }
  0x20   : > { %v3360_v2 = vld [vmem:[%s3680_s29] sm:$0xff]  ;;  %v3361_v3 = vld [vmem:[%s3680_s29 + $0x8] sm:$0xff]  ;;  %v3362_v4 = vld [vmem:[%s3680_s29 + $0x10] sm:$0xff]  ;;  %s3359_s17 = sshll.u32 %s384_s16, 4  ;;  %s3060_s25 = sshll.u32 %s4621_s24, 3 }
  0x21   : > { %3138 = vmatmul.msk.bf16.vlgmr.msra.gmra.mxu0 %vm603_vm0, %v3360_v2  ;;  %v3363_v5 = vld [vmem:[%s3680_s29 + $0x18] sm:$0xff]  ;;  %v3364_v6 = vld [vmem:[%s3680_s29 + $0x20] sm:$0xff]  ;;  %v3365_v7 = vld [vmem:[%s3680_s29 + $0x28] sm:$0xff]  ;;  %s3734_s23 = scalar_lea.vmem %s4525_s2, %s3359_s17  ;;  %s4614_s0 = sld [smem:[#allocation39_spill]] }
  0x22   : > { %v3372_v8 = vld [vmem:[%s3680_s29 + $0x60] sm:$0xff]  ;;  %v3366_v9 = vld [vmem:[%s3680_s29 + $0x30] sm:$0xff]  ;;  %v3373_v10 = vld [vmem:[%s3680_s29 + $0x68] sm:$0xff]  ;;  %s4385_s17 = sand.u32 1, %s3558_s10   ;;  %s2930_s27 = scalar_lea.hbm %s4457_s9, %s3719_s14 }
  0x23   : > { %3150 = vmatmul.msk.bf16.vlgmr.msra.gmra.mxu3 %vm603_vm0, %v3372_v8  ;;  %v3367_v11 = vld [vmem:[%s3680_s29 + $0x38] sm:$0xff]  ;;  %v3374_v12 = vld [vmem:[%s3680_s29 + $0x70] sm:$0xff]  ;;  %v3368_v13 = vld [vmem:[%s3680_s29 + $0x40] sm:$0xff]  ;;  %s4518_s21 = sshll.u32 %s4385_s17, 4  ;;  %s2902_s13 = scalar_lea.sflag [#allocation5], %s4385_s17 }
  0x24   : > { %v3375_v18 = vld [vmem:[%s3680_s29 + $0x78] sm:$0xff]  ;;  %v3369_v19 = vld [vmem:[%s3680_s29 + $0x48] sm:$0xff]  ;;  %v3370_v24 = vld [vmem:[%s3680_s29 + $0x50] sm:$0xff]  ;;  %s370_s22 = scalar_lea.vmem [#allocation4], %s4518_s21 }
  0x25   : > { %v3739_v28 = vld [vmem:[%s3734_s23 + $0x8] sm:$0xff]  ;;  %v3742_v29 = vld [vmem:[%s3734_s23 + $0x10] sm:$0xff]  ;;  %v3371_v31 = vld [vmem:[%s3680_s29 + $0x58] sm:$0xff]  ;;  %s2931_s24 = sshll.u32 %s370_s22, 4  ;;  %s2932_s24 = int_to_ptr.vmem [resolvable:$true] %s2931_s24 }
  0x26   : > { %v3754_v32 = vld [vmem:[%s3734_s23] sm:$0xff]  ;;  %v3759_v34 = vld [vmem:[%s3734_s23 + $0x18] sm:$0xff]  ;;  %v3776_v40 = vld [vmem:[%s3734_s23 + $0x28] sm:$0xff] }
  0x27   : > { %v3767_v37 = vld [vmem:[%s3734_s23 + $0x20] sm:$0xff]  ;;  %v3787_v44 = vld [vmem:[%s3734_s23 + $0x30] sm:$0xff]  ;;  %v3792_v46 = vld [vmem:[%s3734_s23 + $0x38] sm:$0xff]  ;;  %s375_s28 = scalar_lea.vmem %s4614_s0, %s3060_s25  ;;  %s3492_s0 = scalar_lea.hbm %s4457_s9, 32 }
  0x28   : > { %v3799_v49 = vld [vmem:[%s3734_s23 + $0x40] sm:$0xff]  ;;  %v3808_v52 = vld [vmem:[%s3734_s23 + $0x48] sm:$0xff]  ;;  %v3815_v56 = vld [vmem:[%s3734_s23 + $0x50] sm:$0xff] }
  0x29   : > { %v3824_v60 = vld [vmem:[%s3734_s23 + $0x58] sm:$0xff]  ;;  %v3834_v1 = vld [vmem:[%s3734_s23 + $0x70] sm:$0xff] }
  0x31   : > { %3139 = vmatmul.msk.bf16.gmra.mxu0 %vm603_vm0, %v3361_v3  ;;  %v3838_v3 = vld [vmem:[%s3734_s23 + $0x60] sm:$0xff] }
  0x33   : > { %3151 = vmatmul.msk.bf16.gmra.mxu3 %vm603_vm0, %v3373_v10 }
  0x41   : > { %3140 = vmatmul.msk.bf16.gmra.mxu0 %vm603_vm0, %v3362_v4 }
  0x43   : > { %3152 = vmatmul.msk.bf16.gmra.mxu3 %vm603_vm0, %v3374_v12 }
  0x51   : > { %3141 = vmatmul.msk.bf16.gmra.mxu0 %vm603_vm0, %v3363_v5  ;;  %v3845_v5 = vld [vmem:[%s3734_s23 + $0x78] sm:$0xff] }
  0x53   : > { %3153 = vmatmul.msk.bf16.gmra.mxu3 %vm603_vm0, %v3375_v18  ;;  %v3863_v18 = vld [vmem:[%s3734_s23 + $0x80] sm:$0xff] }
  0x61   : > { %3142 = vmatmul.msk.bf16.gmra.mxu0 %vm603_vm0, %v3364_v6 }
  0x71   : > { %3143 = vmatmul.msk.bf16.gmra.mxu0 %vm603_vm0, %v3365_v7  ;;  %v3850_v7 = vld [vmem:[%s3734_s23 + $0x68] sm:$0xff] }
  0x81   : > { %3144 = vmatmul.msk.bf16.gmra.mxu0 %vm603_vm0, %v3366_v9 }
  0x91   : > { %3145 = vmatmul.msk.bf16.gmra.mxu0 %vm603_vm0, %v3367_v11 }
  0x9e   : > { %v661_v14 = vpop.f32.mrf.mxu0 }
  0x9f   : > { %v3708_v17 = vmax.f32 %v661_v14, 0.0 }
  0xa1   : > { %3146 = vmatmul.msk.bf16.gmra.mxu0 %vm603_vm0, %v3368_v13 }
  0xa6   : > { %v663_v15 = vpop.f32.mrf.mxu0  ;;  %v721_v53 = vpop.f32.mrf.mxu3 }
  0xa7   : > { %v3706_v16 = vmax.f32 %v663_v15, 0.0 }
  0xa9   : > { %794 = vmatpush.msra.mxu1 %v3706_v16  ;;  %3406 = vmatpush.msrb.mxu3 %v3706_v16 }
  0xab   : > { %795 = vmatpush.msra.mxu1 %v3708_v17  ;;  %3407 = vmatpush.msrb.mxu3 %v3708_v17 }
  0xac   : > { %3155 = vmatmul.msk.f32.vlgmr.msrb.gmra.mxu3 %vm773_vm1, %v3739_v28  ;;  %3154 = vmatmul.msk.f32.vlgmr.msra.gmra.mxu1 %vm773_vm1, %v3754_v32 }
  0xae   : > { %v666_v20 = vpop.f32.mrf.mxu0  ;;  %v723_v58 = vpop.f32.mrf.mxu3 }
  0xaf   : > { %v3723_v23 = vmax.f32 %v666_v20, 0.0 }
  0xb1   : > { %3147 = vmatmul.msk.bf16.gmra.mxu0 %vm603_vm0, %v3369_v19 }
  0xb6   : > { %v668_v21 = vpop.f32.mrf.mxu0  ;;  %v726_v61 = vpop.f32.mrf.mxu3 }
  0xb7   : > { %v3721_v22 = vmax.f32 %v668_v21, 0.0  ;;  %v3870_v21 = vmax.f32 %v723_v58, 0.0 }
  0xb9   : > { %823 = vmatpush.msra.mxu2 %v3721_v22  ;;  %4526 = vst [vmem:[#allocation8_spill] sm:$0xff] %v3870_v21 }
  0xbb   : > { %824 = vmatpush.msra.mxu2 %v3723_v23 }
  0xbc   : > { %3156 = vmatmul.msk.f32.vlgmr.msra.gmra.mxu2 %vm773_vm1, %v3742_v29 }
  0xbe   : > { %v671_v25 = vpop.f32.mrf.mxu0  ;;  %v728_v2 = vpop.f32.mrf.mxu3 }
  0xbf   : > { %v3748_v30 = vmax.f32 %v671_v25, 0.0  ;;  %v3875_v25 = vmax.f32 %v721_v53, 0.0  ;;  %v3909_v53 = vld [vmem:[%s4452_s4 + $0x38] sm:$0xff] }
  0xc0   : > { %4533 = vst [vmem:[#allocation15_spill] sm:$0xff] %v3909_v53 }
  0xc1   : > { %3148 = vmatmul.msk.bf16.gmra.mxu0 %vm603_vm0, %v3370_v24  ;;  %4528 = vst [vmem:[#allocation10_spill] sm:$0xff] %v3875_v25 }
  0xc4   : > { %3157 = vmatmul.msk.f32.gmra.mxu2 %vm773_vm1, %v3759_v34 }
  0xc6   : > { %v673_v26 = vpop.f32.mrf.mxu0  ;;  %v731_v6 = vpop.f32.mrf.mxu3 }
  0xc7   : > { %v3736_v27 = vmax.f32 %v673_v26, 0.0  ;;  %v3879_v26 = vld [vmem:[%s3734_s23 + $0x90] sm:$0xff] }
  0xc9   : > { %852 = vmatpush.msra.mxu3 %v3736_v27 }
  0xcb   : > { %853 = vmatpush.msra.mxu3 %v3748_v30 }
  0xcc   : > { %3158 = vmatmul.msk.f32.vlgmr.msra.gmra.mxu3 %vm773_vm1, %v3767_v37 }
  0xce   : > { %v676_v33 = vpop.f32.mrf.mxu0  ;;  %v733_v11 = vpop.f32.mrf.mxu3 }
  0xcf   : > { %v3771_v38 = vmax.f32 %v676_v33, 0.0 }
  0xd1   : > { %3149 = vmatmul.msk.bf16.gmra.mxu0 %vm603_vm0, %v3371_v31 }
  0xd4   : > { %3159 = vmatmul.msk.f32.gmra.mxu3 %vm773_vm1, %v3776_v40 }
  0xd6   : > { %v678_v35 = vpop.f32.mrf.mxu0  ;;  %v736_v13 = vpop.f32.mrf.mxu3 }
  0xd7   : > { %v3764_v36 = vmax.f32 %v678_v35, 0.0  ;;  %v3881_v31 = vmax.f32 %v736_v13, 0.0  ;;  %v3888_v35 = vld [vmem:[%s3734_s23 + $0x88] sm:$0xff]  ;;  %v3945_v13 = vld [vmem:[%s4452_s4 + $0x20] sm:$0xff] }
  0xd8   : > { %4540 = vst [vmem:[#allocation22_spill] sm:$0xff] %v3945_v13 }
  0xd9   : > { %881 = vmatpush.msrb.mxu1 %v3764_v36  ;;  %4529 = vst [vmem:[#allocation11_spill] sm:$0xff] %v3881_v31 }
  0xdb   : > { %882 = vmatpush.msrb.mxu1 %v3771_v38 }
  0xdc   : > { %3160 = vmatmul.msk.f32.vlgmr.msrb.gmra.mxu1 %vm773_vm1, %v3787_v44 }
  0xde   : > { %v681_v39 = vpop.f32.mrf.mxu0  ;;  %v738_v20 = vpop.f32.mrf.mxu3 }
  0xdf   : > { %v3782_v43 = vmax.f32 %v681_v39, 0.0  ;;  %v3873_v24 = vmax.f32 %v738_v20, 0.0  ;;  %v3951_v20 = vld [vmem:[%s3734_s23 + $0xd0] sm:$0xff] }
  0xe0   : > { %4542 = vst [vmem:[#allocation24_spill] sm:$0xff] %v3951_v20 }
  0xe1   : > { %4527 = vst [vmem:[#allocation9_spill] sm:$0xff] %v3873_v24 }
  0xe4   : > { %3161 = vmatmul.msk.f32.gmra.mxu1 %vm773_vm1, %v3792_v46 }
  0xe6   : > { %v683_v41 = vpop.f32.mrf.mxu0 }
  0xe7   : > { %v3780_v42 = vmax.f32 %v683_v41, 0.0 }
  0xe9   : > { %910 = vmatpush.msrb.mxu2 %v3780_v42 }
  0xeb   : > { %911 = vmatpush.msrb.mxu2 %v3782_v43 }
  0xec   : > { %3162 = vmatmul.msk.f32.vlgmr.msrb.gmra.mxu2 %vm773_vm1, %v3799_v49 }
  0xee   : > { %v686_v45 = vpop.f32.mrf.mxu0 }
  0xef   : > { %v3803_v50 = vmax.f32 %v686_v45, 0.0 }
  0xf4   : > { %3163 = vmatmul.msk.f32.gmra.mxu2 %vm773_vm1, %v3808_v52 }
  0xf6   : > { %v688_v47 = vpop.f32.mrf.mxu0 }
  0xf7   : > { %v3796_v48 = vmax.f32 %v688_v47, 0.0  ;;  %v3899_v47 = vld [vmem:[%s3734_s23 + $0xa0] sm:$0xff] }
  0xf8   : > { %4531 = vst [vmem:[#allocation13_spill] sm:$0xff] %v3899_v47 }
  0xf9   : > { %939 = vmatpush.msrb.mxu3 %v3796_v48 }
  0xfb   : > { %940 = vmatpush.msrb.mxu3 %v3803_v50 }
  0xfc   : > { %3164 = vmatmul.msk.f32.vlgmr.msrb.gmra.mxu3 %vm773_vm1, %v3815_v56 }
  0xfe   : > { %v691_v51 = vpop.f32.mrf.mxu0 }
  0xff   : > { %v3819_v57 = vmax.f32 %v691_v51, 0.0  ;;  %v3901_v51 = vmax.f32 %v728_v2, 0.0  ;;  %v3933_v2 = vld [vmem:[%s4452_s4 + $0x28] sm:$0xff] }
 0x100   : > { %4537 = vst [vmem:[#allocation19_spill] sm:$0xff] %v3933_v2 }
 0x101   : > { %4532 = vst [vmem:[#allocation14_spill] sm:$0xff] %v3901_v51 }
 0x104   : > { %3165 = vmatmul.msk.f32.gmra.mxu3 %vm773_vm1, %v3824_v60 }
 0x106   : > { %v693_v54 = vpop.f32.mrf.mxu0 }
 0x107   : > { %v3812_v55 = vmax.f32 %v693_v54, 0.0  ;;  %v3911_v54 = vmax.f32 %v726_v61, 0.0  ;;  %v3927_v61 = vld [vmem:[%s3734_s23 + $0xa8] sm:$0xff] }
 0x108   : > { %4536 = vst [vmem:[#allocation18_spill] sm:$0xff] %v3927_v61 }
 0x109   : > { %968 = vmatpush.msra.mxu1 %v3812_v55  ;;  %4534 = vst [vmem:[#allocation16_spill] sm:$0xff] %v3911_v54 }
 0x10b   : > { %969 = vmatpush.msra.mxu1 %v3819_v57 }
 0x10c   : > { %3166 = vmatmul.msk.f32.vlgmr.msra.gmra.mxu1 %vm773_vm1, %v3838_v3 }
 0x10e   : > { %v696_v59 = vpop.f32.mrf.mxu0 }
 0x10f   : > { %v3830_v0 = vmax.f32 %v696_v59, 0.0  ;;  %v3916_v59 = vld [vmem:[%s3734_s23 + $0x98] sm:$0xff] }
 0x114   : > { %3167 = vmatmul.msk.f32.gmra.mxu1 %vm773_vm1, %v3850_v7 }
 0x116   : > { %v698_v62 = vpop.f32.mrf.mxu0 }
 0x117   : > { %v3828_v63 = vmax.f32 %v698_v62, 0.0  ;;  %v3922_v62 = vld [vmem:[%s4452_s4 + $0x30] sm:$0xff] }
 0x118   : > { %4535 = vst [vmem:[#allocation17_spill] sm:$0xff] %v3922_v62 }
 0x119   : > { %997 = vmatpush.msra.mxu2 %v3828_v63 }
 0x11b   : > { %998 = vmatpush.msra.mxu2 %v3830_v0 }
 0x11c   : > { %3168 = vmatmul.msk.f32.vlgmr.msra.gmra.mxu2 %vm773_vm1, %v3834_v1 }
 0x11e   : > { %v701_v4 = vpop.f32.mrf.mxu0 }
 0x11f   : > { %v3856_v10 = vmax.f32 %v701_v4, 0.0 }
 0x124   : > { %3169 = vmatmul.msk.f32.gmra.mxu2 %vm773_vm1, %v3845_v5 }
 0x126   : > { %v703_v8 = vpop.f32.mrf.mxu0 }
 0x127   : > { %v3854_v9 = vmax.f32 %v703_v8, 0.0 }
 0x129   : > { %1026 = vmatpush.msra.mxu3 %v3854_v9 }
 0x12b   : > { %1027 = vmatpush.msra.mxu3 %v3856_v10 }
 0x12c   : > { %3170 = vmatmul.msk.f32.vlgmr.msra.gmra.mxu3 %vm773_vm1, %v3863_v18 }
 0x12e   : > { %v706_v12 = vpop.f32.mrf.mxu0 }
 0x12f   : > { %v3865_v19 = vmax.f32 %v706_v12, 0.0 }
 0x134   : > { %3171 = vmatmul.msk.f32.gmra.mxu3 %vm773_vm1, %v3888_v35 }
 0x136   : > { %v708_v14 = vpop.f32.mrf.mxu0 }
 0x137   : > { %v3860_v15 = vmax.f32 %v708_v14, 0.0  ;;  %v3948_v14 = vmax.f32 %v733_v11, 0.0  ;;  %v3967_v11 = vld [vmem:[%s3734_s23 + $0xb0] sm:$0xff] }
 0x138   : > { %4545 = vst [vmem:[#allocation27_spill] sm:$0xff] %v3967_v11 }
 0x139   : > { %1055 = vmatpush.msrb.mxu1 %v3860_v15  ;;  %4541 = vst [vmem:[#allocation23_spill] sm:$0xff] %v3948_v14 }
 0x13b   : > { %1056 = vmatpush.msrb.mxu1 %v3865_v19 }
 0x13c   : > { %3172 = vmatmul.msk.f32.vlgmr.msrb.gmra.mxu1 %vm773_vm1, %v3879_v26 }
 0x13d   : > { %1142 = vmatpush.msra.mxu1 %v3870_v21 }
 0x13e   : > { %v711_v33 = vpop.f32.mrf.mxu0 }
 0x13f   : > { %1143 = vmatpush.msra.mxu1 %v3875_v25  ;;  %v3895_v45 = vmax.f32 %v711_v33, 0.0  ;;  %v3954_v33 = vmax.f32 %v731_v6, 0.0  ;;  %v3973_v6 = vld [vmem:[%s4452_s4 + $0x10] sm:$0xff] }
 0x140   : > { %4546 = vst [vmem:[#allocation28_spill] sm:$0xff] %v3973_v6 }
 0x141   : > { %1229 = vmatpush.msrb.mxu1 %v3873_v24  ;;  %4543 = vst [vmem:[#allocation25_spill] sm:$0xff] %v3954_v33  ;;  %v3992_v24 = vld [vmem:[%s4452_s4] sm:$0xff] }
 0x142   : > { %4549 = vst [vmem:[#allocation31_spill] sm:$0xff] %v3992_v24 }
 0x143   : > { %1230 = vmatpush.msrb.mxu1 %v3881_v31 }
 0x144   : > { %3173 = vmatmul.msk.f32.gmra.mxu1 %vm773_vm1, %v3916_v59 }
 0x146   : > { %v713_v39 = vpop.f32.mrf.mxu0 }
 0x147   : > { %v3893_v41 = vmax.f32 %v713_v39, 0.0  ;;  %v3961_v39 = vld [vmem:[%s4452_s4 + $0x18] sm:$0xff] }
 0x148   : > { %4544 = vst [vmem:[#allocation26_spill] sm:$0xff] %v3961_v39 }
 0x149   : > { %4530 = vst [vmem:[#allocation12_spill] sm:$0xff] %v3893_v41  ;;  %1084 = vmatpush.msrb.mxu2 %v3893_v41 }
 0x14b   : > { %1085 = vmatpush.msrb.mxu2 %v3895_v45 }
 0x14c   : > { %3174 = vmatmul.msk.f32.vlgmr.msrb.gmra.mxu2 %vm773_vm1, %v3899_v47 }
 0x14d   : > { %1171 = vmatpush.msra.mxu2 %v3901_v51 }
 0x14e   : > { %v716_v58 = vpop.f32.mrf.mxu0 }
 0x14f   : > { %1172 = vmatpush.msra.mxu2 %v3911_v54  ;;  %v3937_v8 = vmax.f32 %v716_v58, 0.0  ;;  %v3978_v58 = vld [vmem:[%s3734_s23 + $0xd8] sm:$0xff] }
 0x150   : > { %4547 = vst [vmem:[#allocation29_spill] sm:$0xff] %v3978_v58 }
 0x151   : > { %1302 = vmatpush.bf16.msrb.mxu2 %v3909_v53  ;;  %4538 = vst [vmem:[#allocation20_spill] sm:$0xff] %v3937_v8 }
 0x154   : > { %3175 = vmatmul.msk.f32.gmra.mxu2 %vm773_vm1, %v3927_v61 }
 0x155   : > { %1303 = vmatpush.bf16.msrb.mxu2 %v3922_v62  ;;  %v826_v62 = vpop.f32.mrf.mxu2 }
 0x156   : > { %v718_v4 = vpop.f32.mrf.mxu0 }
 0x157   : > { %v3939_v12 = vmax.f32 %v718_v4, 0.0  ;;  %v3984_v4 = vld [vmem:[%s4452_s4 + $0x8] sm:$0xff] }
 0x158   : > { %4548 = vst [vmem:[#allocation30_spill] sm:$0xff] %v3984_v4 }
 0x159   : > { %4539 = vst [vmem:[#allocation21_spill] sm:$0xff] %v3939_v12  ;;  %1304 = vmatpush.bf16.msrb.mxu2 %v3933_v2  ;;  %1113 = vmatpush.msrb.mxu3 %v3939_v12  ;;  %v3999_v2 = vld [vmem:[%s3734_s23 + $0xc0] sm:$0xff] }
 0x15a   : > { %4551 = vst [vmem:[#allocation33_spill] sm:$0xff] %v3999_v2  ;;  %3178 = vmatmul.msk.f32.vlgmr.msra.gmra.mxu1 %vm773_vm1, %v3999_v2 }
 0x15b   : > { %1114 = vmatpush.msrb.mxu3 %v3937_v8 }
 0x15c   : > { %3180 = vmatmul.msk.f32.vlgmr.msra.gmra.mxu2 %vm773_vm1, %v3951_v20  ;;  %3176 = vmatmul.msk.f32.vlgmr.msrb.gmra.mxu3 %vm773_vm1, %v3967_v11 }
 0x15d   : > { %1305 = vmatpush.bf16.msrb.mxu2 %v3945_v13  ;;  %1200 = vmatpush.msra.mxu3 %v3948_v14  ;;  %v800_v13 = vpop.f32.mrf.mxu3  ;;  %v4011_v14 = vld [vmem:[%s3734_s23 + $0xe0] sm:$0xff] }
 0x15e   : > { %4553 = vst [vmem:[#allocation35_spill] sm:$0xff] %v4011_v14 }
 0x15f   : > { %1201 = vmatpush.msra.mxu3 %v3954_v33 }
 0x161   : > { %1306 = vmatpush.bf16.msrb.mxu2 %v3961_v39  ;;  %v797_v39 = vpop.f32.mrf.mxu1 }
 0x162   : > { %v1238_v31 = vpack.c.bf16 %v800_v13, %v797_v39  ;;  %v4006_v13 = vld [vmem:[%s3734_s23 + $0xc8] sm:$0xff] }
 0x163   : > { %4552 = vst [vmem:[#allocation34_spill] sm:$0xff] %v4006_v13  ;;  %3179 = vmatmul.msk.f32.gmra.mxu1 %vm773_vm1, %v4006_v13 }
 0x164   : > { %3181 = vmatmul.msk.f32.gmra.mxu2 %vm773_vm1, %v3978_v58 }
 0x165   : > { %1307 = vmatpush.bf16.msrb.mxu2 %v3973_v6  ;;  %v3996_v6 = vld [vmem:[%s3734_s23 + $0xb8] sm:$0xff]  ;;  %v855_v39 = vpop.f32.mrf.mxu3 }
 0x166   : > { %4550 = vst [vmem:[#allocation32_spill] sm:$0xff] %v3996_v6  ;;  %3177 = vmatmul.msk.f32.gmra.mxu3 %vm773_vm1, %v3996_v6 }
 0x169   : > { %1308 = vmatpush.bf16.msrb.mxu2 %v3984_v4  ;;  %v829_v4 = vpop.f32.mrf.mxu2  ;;  %v884_v33 = vpop.f32.mrf.mxu1 }
 0x16a   : > { %v1239_v53 = vpack.c.bf16 %v829_v4, %v826_v62 }
 0x16d   : > { %1309 = vmatpush.bf16.msrb.mxu2 %v3992_v24 }
 0x16e   : > { %3182 = vmatmul.msk.f32.vlgmr.msra.gmra.mxu3 %vm773_vm1, %v4011_v14 }
 0x170   : > { %1310 = vmatmul.bf16.vlgmr.msrb.gmra.mxu2 %v1238_v31  ;;  %v858_v31 = vpop.f32.mrf.mxu3 }
 0x171   : > { %v1240_v24 = vpack.c.bf16 %v858_v31, %v855_v39  ;;  %v887_v58 = vpop.f32.mrf.mxu1  ;;  %v913_v4 = vpop.f32.mrf.mxu2  ;;  %v4026_v31 = vld [vmem:[%s3734_s23 + $0xf8] sm:$0xff] }
 0x172   : > { %v1241_v62 = vpack.c.bf16 %v887_v58, %v884_v33  ;;  %4556 = vst [vmem:[#allocation38_spill] sm:$0xff] %v4026_v31 }
 0x179   : > { %v916_v20 = vpop.f32.mrf.mxu2 }
 0x17a   : > { %v1242_v51 = vpack.c.bf16 %v916_v20, %v913_v4 }
 0x17f   : > { %v942_v39 = vpop.f32.mrf.mxu3 }
 0x180   : > { %1315 = vmatmul.bf16.gmra.mxu2 %v1239_v53  ;;  %v4016_v53 = vld [vmem:[%s3734_s23 + $0xe8] sm:$0xff] }
 0x181   : > { %4554 = vst [vmem:[#allocation36_spill] sm:$0xff] %v4016_v53  ;;  %3183 = vmatmul.msk.f32.gmra.mxu3 %vm773_vm1, %v4016_v53 }
 0x187   : > { %v945_v14 = vpop.f32.mrf.mxu3 }
 0x188   : > { %v1243_v58 = vpack.c.bf16 %v945_v14, %v942_v39 }
 0x190   : > { %1320 = vmatmul.bf16.gmra.mxu2 %v1240_v24  ;;  %v4021_v24 = vld [vmem:[%s3734_s23 + $0xf0] sm:$0xff] }
 0x191   : > { %4555 = vst [vmem:[#allocation37_spill] sm:$0xff] %v4021_v24  ;;  %3184 = vmatmul.msk.f32.vlgmr.msrb.gmra.mxu1 %vm773_vm1, %v4021_v24 }
 0x199   : > { %3185 = vmatmul.msk.f32.gmra.mxu1 %vm773_vm1, %v4026_v31 }
 0x19f   : > { %v1000_v33 = vpop.f32.mrf.mxu2 }
 0x1a0   : > { %1325 = vmatmul.bf16.gmra.mxu2 %v1241_v62  ;;  %v971_v62 = vpop.f32.mrf.mxu1 }
 0x1a7   : > { %v1003_v53 = vpop.f32.mrf.mxu2 }
 0x1a8   : > { %v974_v54 = vpop.f32.mrf.mxu1  ;;  %v1245_v13 = vpack.c.bf16 %v1003_v53, %v1000_v33 }
 0x1a9   : > { %v1244_v20 = vpack.c.bf16 %v974_v54, %v971_v62 }
 0x1af   : > { %v1029_v2 = vpop.f32.mrf.mxu3 }
 0x1b0   : > { %1330 = vmatmul.bf16.gmra.mxu2 %v1242_v51 }
 0x1b7   : > { %v1032_v25 = vpop.f32.mrf.mxu3 }
 0x1b8   : > { %v1246_v14 = vpack.c.bf16 %v1032_v25, %v1029_v2 }
 0x1b9   : > { %v1058_v39 = vpop.f32.mrf.mxu1 }
 0x1c0   : > { %1335 = vmatmul.bf16.gmra.mxu2 %v1243_v58 }
 0x1c1   : > { %v1061_v6 = vpop.f32.mrf.mxu1 }
 0x1cf   : > { %v1087_v51 = vpop.f32.mrf.mxu2 }
 0x1d0   : > { %1340 = vmatmul.bf16.gmra.mxu2 %v1244_v20 }
 0x1d7   : > { %v1090_v4 = vpop.f32.mrf.mxu2 }
 0x1df   : > { %v4030_v24 = vpop.f32.mrf.mxu2 }
 0x1e0   : > { %1345 = vmatmul.bf16.gmra.mxu2 %v1245_v13  ;;  %v1247_v13 = vpack.c.bf16 %v1061_v6, %v1058_v39  ;;  %v1116_v39 = vpop.f32.mrf.mxu3 }
 0x1e7   : > { %v4032_v21 = vpop.f32.mrf.mxu2 }
 0x1e8   : > { %v1251_v31 = vpack.c.bf16 %v4032_v21, %v4030_v24 }
 0x1f0   : > { %1350 = vmatmul.bf16.gmra.mxu2 %v1246_v14 }
 0x1f3   : > { %v1311_v58 = vpop.f32.mrf.mxu2 }
 0x1f4   : > { %v1391_v62 = vadd.f32 %v1311_v58, %v3708_v17  ;;  %v1248_v58 = vpack.c.bf16 %v1090_v4, %v1087_v51 }
 0x1f6   : > { %v1423_v20 = vmax.f32 %v1391_v62, 0.0 }
 0x1fb   : > { %v1313_v54 = vpop.f32.mrf.mxu2 }
 0x1fc   : > { %v1392_v53 = vadd.f32 %v1313_v54, %v3706_v16 }
 0x1fe   : > { %v1424_v33 = vmax.f32 %v1392_v53, 0.0  ;;  %v1119_v53 = vpop.f32.mrf.mxu3 }
 0x1ff   : > { %v1249_v51 = vpack.c.bf16 %v1119_v53, %v1116_v39 }
 0x200   : > { %1355 = vmatmul.bf16.gmra.mxu2 %v1247_v13  ;;  %1469 = vmatpush.msrb.mxu3 %v1424_v33 }
 0x202   : > { %1470 = vmatpush.msrb.mxu3 %v1423_v20 }
 0x203   : > { %v1316_v11 = vpop.f32.mrf.mxu2  ;;  %3218 = vmatmul.msk.f32.vlgmr.msrb.gmra.mxu3 %vm773_vm1, %v3754_v32 }
 0x204   : > { %v1393_v2 = vadd.f32 %v1316_v11, %v3723_v23 }
 0x206   : > { %v1425_v6 = vmax.f32 %v1393_v2, 0.0 }
 0x20b   : > { %v1318_v25 = vpop.f32.mrf.mxu2  ;;  %3219 = vmatmul.msk.f32.gmra.mxu3 %vm773_vm1, %v3739_v28 }
 0x20c   : > { %v1394_v14 = vadd.f32 %v1318_v25, %v3721_v22  ;;  %v1145_v25 = vpop.f32.mrf.mxu1 }
 0x20e   : > { %v1426_v54 = vmax.f32 %v1394_v14, 0.0 }
 0x210   : > { %1360 = vmatmul.bf16.gmra.mxu2 %v1248_v58  ;;  %1492 = vmatpush.msra.mxu1 %v1426_v54 }
 0x212   : > { %1493 = vmatpush.msra.mxu1 %v1425_v6 }
 0x213   : > { %v1321_v62 = vpop.f32.mrf.mxu2  ;;  %3220 = vmatmul.msk.f32.vlgmr.msra.gmra.mxu1 %vm773_vm1, %v3742_v29 }
 0x214   : > { %v1395_v11 = vadd.f32 %v1321_v62, %v3748_v30  ;;  %v1148_v14 = vpop.f32.mrf.mxu1 }
 0x215   : > { %v1250_v39 = vpack.c.bf16 %v1148_v14, %v1145_v25  ;;  %v1203_v25 = vpop.f32.mrf.mxu3 }
 0x216   : > { %v1427_v20 = vmax.f32 %v1395_v11, 0.0 }
 0x21b   : > { %v1323_v13 = vpop.f32.mrf.mxu2  ;;  %3221 = vmatmul.msk.f32.gmra.mxu1 %vm773_vm1, %v3759_v34 }
 0x21c   : > { %v1396_v33 = vadd.f32 %v1323_v13, %v3736_v27  ;;  %v1232_v21 = vpop.f32.mrf.mxu1 }
 0x21d   : > { %v1206_v14 = vpop.f32.mrf.mxu3 }
 0x21e   : > { %v1428_v4 = vmax.f32 %v1396_v33, 0.0 }
 0x220   : > { %1365 = vmatmul.bf16.gmra.mxu2 %v1249_v51  ;;  %1515 = vmatpush.msra.mxu3 %v1428_v4 }
 0x222   : > { %1516 = vmatpush.msra.mxu3 %v1427_v20 }
 0x223   : > { %v1326_v2 = vpop.f32.mrf.mxu2  ;;  %3222 = vmatmul.msk.f32.vlgmr.msra.gmra.mxu3 %vm773_vm1, %v3767_v37 }
 0x224   : > { %v1397_v54 = vadd.f32 %v1326_v2, %v3771_v38 }
 0x226   : > { %v1429_v53 = vmax.f32 %v1397_v54, 0.0 }
 0x22b   : > { %v1328_v58 = vpop.f32.mrf.mxu2  ;;  %3223 = vmatmul.msk.f32.gmra.mxu3 %vm773_vm1, %v3776_v40 }
 0x22c   : > { %v1398_v6 = vadd.f32 %v1328_v58, %v3764_v36 }
 0x22e   : > { %v1430_v62 = vmax.f32 %v1398_v6, 0.0 }
 0x230   : > { %1370 = vmatmul.bf16.gmra.mxu2 %v1250_v39  ;;  %1538 = vmatpush.msrb.mxu1 %v1430_v62  ;;  %v1252_v39 = vpack.c.bf16 %v1206_v14, %v1203_v25 }
 0x232   : > { %1539 = vmatpush.msrb.mxu1 %v1429_v53  ;;  %v1235_v53 = vpop.f32.mrf.mxu1 }
 0x233   : > { %v1331_v13 = vpop.f32.mrf.mxu2  ;;  %3224 = vmatmul.msk.f32.vlgmr.msrb.gmra.mxu1 %vm773_vm1, %v3787_v44 }
 0x234   : > { %v1399_v33 = vadd.f32 %v1331_v13, %v3782_v43 }
 0x236   : > { %v1431_v20 = vmax.f32 %v1399_v33, 0.0 }
 0x23b   : > { %v1333_v11 = vpop.f32.mrf.mxu2  ;;  %3225 = vmatmul.msk.f32.gmra.mxu1 %vm773_vm1, %v3792_v46 }
 0x23c   : > { %v1400_v51 = vadd.f32 %v1333_v11, %v3780_v42 }
 0x23e   : > { %v1432_v4 = vmax.f32 %v1400_v51, 0.0  ;;  %v1253_v51 = vpack.c.bf16 %v1235_v53, %v1232_v21 }
 0x240   : > { %1375 = vmatmul.bf16.gmra.mxu2 %v1251_v31  ;;  %1561 = vmatpush.msrb.mxu3 %v1432_v4 }
 0x242   : > { %1562 = vmatpush.msrb.mxu3 %v1431_v20 }
 0x243   : > { %v1336_v2 = vpop.f32.mrf.mxu2  ;;  %3226 = vmatmul.msk.f32.vlgmr.msrb.gmra.mxu3 %vm773_vm1, %v3799_v49 }
 0x244   : > { %v1401_v54 = vadd.f32 %v1336_v2, %v3803_v50 }
 0x246   : > { %v1433_v24 = vmax.f32 %v1401_v54, 0.0 }
 0x24b   : > { %v1338_v58 = vpop.f32.mrf.mxu2  ;;  %3227 = vmatmul.msk.f32.gmra.mxu3 %vm773_vm1, %v3808_v52 }
 0x24c   : > { %v1402_v6 = vadd.f32 %v1338_v58, %v3796_v48 }
 0x24e   : > { %v1434_v62 = vmax.f32 %v1402_v6, 0.0 }
 0x250   : > { %1380 = vmatmul.bf16.gmra.mxu2 %v1252_v39  ;;  %1584 = vmatpush.msra.mxu1 %v1434_v62 }
 0x252   : > { %1585 = vmatpush.msra.mxu1 %v1433_v24 }
 0x253   : > { %v1341_v31 = vpop.f32.mrf.mxu2  ;;  %3228 = vmatmul.msk.f32.vlgmr.msra.gmra.mxu1 %vm773_vm1, %v3815_v56 }
 0x254   : > { %v1403_v11 = vadd.f32 %v1341_v31, %v3819_v57 }
 0x256   : > { %v1435_v20 = vmax.f32 %v1403_v11, 0.0 }
 0x25b   : > { %v1343_v13 = vpop.f32.mrf.mxu2  ;;  %3229 = vmatmul.msk.f32.gmra.mxu1 %vm773_vm1, %v3824_v60 }
 0x25c   : > { %v1404_v33 = vadd.f32 %v1343_v13, %v3812_v55 }
 0x25e   : > { %v1436_v4 = vmax.f32 %v1404_v33, 0.0 }
 0x260   : > { %1385 = vmatmul.bf16.gmra.mxu2 %v1253_v51  ;;  %1607 = vmatpush.msra.mxu3 %v1436_v4 }
 0x262   : > { %1608 = vmatpush.msra.mxu3 %v1435_v20 }
 0x263   : > { %v1346_v25 = vpop.f32.mrf.mxu2  ;;  %3230 = vmatmul.msk.f32.vlgmr.msra.gmra.mxu3 %vm773_vm1, %v3838_v3 }
 0x264   : > { %v1405_v14 = vadd.f32 %v1346_v25, %v3830_v0 }
 0x266   : > { %v1437_v6 = vmax.f32 %v1405_v14, 0.0 }
 0x26b   : > { %v1348_v2 = vpop.f32.mrf.mxu2  ;;  %3231 = vmatmul.msk.f32.gmra.mxu3 %vm773_vm1, %v3850_v7 }
 0x26c   : > { %v1406_v58 = vadd.f32 %v1348_v2, %v3828_v63 }
 0x26e   : > { %v1438_v54 = vmax.f32 %v1406_v58, 0.0 }
 0x270   : > { %1630 = vmatpush.msrb.mxu1 %v1438_v54 }
 0x272   : > { %1631 = vmatpush.msrb.mxu1 %v1437_v6 }
 0x273   : > { %v1351_v39 = vpop.f32.mrf.mxu2  ;;  %3232 = vmatmul.msk.f32.vlgmr.msrb.gmra.mxu1 %vm773_vm1, %v3834_v1 }
 0x274   : > { %v1407_v21 = vadd.f32 %v1351_v39, %v3856_v10 }
 0x276   : > { %v1439_v53 = vmax.f32 %v1407_v21, 0.0 }
 0x27b   : > { %v1353_v62 = vpop.f32.mrf.mxu2  ;;  %3233 = vmatmul.msk.f32.gmra.mxu1 %vm773_vm1, %v3845_v5 }
 0x27c   : > { %v1408_v24 = vadd.f32 %v1353_v62, %v3854_v9 }
 0x27e   : > { %v1440_v31 = vmax.f32 %v1408_v24, 0.0 }
 0x280   : > { %1653 = vmatpush.msrb.mxu3 %v1440_v31 }
 0x282   : > { %1654 = vmatpush.msrb.mxu3 %v1439_v53 }
 0x283   : > { %v1356_v13 = vpop.f32.mrf.mxu2  ;;  %3234 = vmatmul.msk.f32.vlgmr.msrb.gmra.mxu3 %vm773_vm1, %v3863_v18 }
 0x284   : > { %v1409_v33 = vadd.f32 %v1356_v13, %v3865_v19 }
 0x286   : > { %v1441_v20 = vmax.f32 %v1409_v33, 0.0 }
 0x28b   : > { %v1358_v11 = vpop.f32.mrf.mxu2  ;;  %3235 = vmatmul.msk.f32.gmra.mxu3 %vm773_vm1, %v3888_v35 }
 0x28c   : > { %v1410_v51 = vadd.f32 %v1358_v11, %v3860_v15  ;;  %v4557_v11 = vld [vmem:[#allocation27_spill] sm:$0xff] }
 0x28e   : > { %v1442_v4 = vmax.f32 %v1410_v51, 0.0  ;;  %v4558_v51 = vld [vmem:[#allocation32_spill] sm:$0xff] }
 0x290   : > { %1676 = vmatpush.msra.mxu1 %v1442_v4  ;;  %v4559_v4 = vld [vmem:[#allocation10_spill] sm:$0xff] }
 0x292   : > { %1677 = vmatpush.msra.mxu1 %v1441_v20 }
 0x293   : > { %v1361_v25 = vpop.f32.mrf.mxu2  ;;  %3236 = vmatmul.msk.f32.vlgmr.msra.gmra.mxu1 %vm773_vm1, %v3879_v26 }
 0x294   : > { %v1411_v14 = vadd.f32 %v1361_v25, %v3895_v45  ;;  %v4560_v25 = vld [vmem:[#allocation8_spill] sm:$0xff] }
 0x296   : > { %v1443_v6 = vmax.f32 %v1411_v14, 0.0 }
 0x29b   : > { %v1363_v2 = vpop.f32.mrf.mxu2  ;;  %3237 = vmatmul.msk.f32.gmra.mxu1 %vm773_vm1, %v3916_v59 }
 0x29c   : > { %v1412_v58 = vadd.f32 %v1363_v2, %v3893_v41 }
 0x29e   : > { %v1444_v54 = vmax.f32 %v1412_v58, 0.0 }
 0x2a0   : > { %1699 = vmatpush.msra.mxu3 %v1444_v54 }
 0x2a2   : > { %1700 = vmatpush.msra.mxu3 %v1443_v6  ;;  %v4561_v6 = vld [vmem:[#allocation33_spill] sm:$0xff] }
 0x2a3   : > { %v1366_v39 = vpop.f32.mrf.mxu2  ;;  %3238 = vmatmul.msk.f32.vlgmr.msra.gmra.mxu3 %vm773_vm1, %v3899_v47 }
 0x2a4   : > { %v1413_v21 = vadd.f32 %v1366_v39, %v3937_v8 }
 0x2a6   : > { %v1445_v53 = vmax.f32 %v1413_v21, 0.0  ;;  %v4563_v21 = vld [vmem:[#allocation16_spill] sm:$0xff] }
 0x2ab   : > { %v1368_v62 = vpop.f32.mrf.mxu2  ;;  %3239 = vmatmul.msk.f32.gmra.mxu3 %vm773_vm1, %v3927_v61 }
 0x2ac   : > { %v1414_v24 = vadd.f32 %v1368_v62, %v3939_v12  ;;  %v4562_v62 = vld [vmem:[#allocation34_spill] sm:$0xff] }
 0x2ae   : > { %v1446_v31 = vmax.f32 %v1414_v24, 0.0 }
 0x2b0   : > { %1722 = vmatpush.msrb.mxu1 %v1446_v31  ;;  %v4564_v31 = vld [vmem:[#allocation14_spill] sm:$0xff] }
 0x2b2   : > { %1723 = vmatpush.msrb.mxu1 %v1445_v53 }
 0x2b3   : > { %v1371_v13 = vpop.f32.mrf.mxu2  ;;  %3240 = vmatmul.msk.f32.vlgmr.msrb.gmra.mxu1 %vm773_vm1, %v4557_v11 }
 0x2b4   : > { %v1415_v20 = vadd.f32 %v1371_v13, %v4559_v4 }
 0x2b6   : > { %v1447_v58 = vmax.f32 %v1415_v20, 0.0  ;;  %v4565_v20 = vld [vmem:[#allocation24_spill] sm:$0xff] }
 0x2bb   : > { %v1373_v33 = vpop.f32.mrf.mxu2  ;;  %3241 = vmatmul.msk.f32.gmra.mxu1 %vm773_vm1, %v4558_v51 }
 0x2bc   : > { %v1416_v2 = vadd.f32 %v1373_v33, %v4560_v25 }
 0x2be   : > { %v1448_v14 = vmax.f32 %v1416_v2, 0.0  ;;  %v1472_v2 = vpop.f32.mrf.mxu3 }
 0x2c0   : > { %1745 = vmatpush.msrb.mxu3 %v1448_v14 }
 0x2c2   : > { %1746 = vmatpush.msrb.mxu3 %v1447_v58  ;;  %v4566_v58 = vld [vmem:[#allocation29_spill] sm:$0xff] }
 0x2c3   : > { %v1376_v54 = vpop.f32.mrf.mxu2  ;;  %3242 = vmatmul.msk.f32.vlgmr.msrb.gmra.mxu3 %vm773_vm1, %v4561_v6  ;;  %v4567_v6 = vld [vmem:[#allocation25_spill] sm:$0xff] }
 0x2c4   : > { %v1417_v24 = vadd.f32 %v1376_v54, %v4563_v21 }
 0x2c6   : > { %v1449_v13 = vmax.f32 %v1417_v24, 0.0  ;;  %v4569_v24 = vld [vmem:[#allocation15_spill] sm:$0xff] }
 0x2cb   : > { %v1378_v39 = vpop.f32.mrf.mxu2  ;;  %3243 = vmatmul.msk.f32.gmra.mxu3 %vm773_vm1, %v4562_v62  ;;  %v4568_v62 = vld [vmem:[#allocation23_spill] sm:$0xff] }
 0x2cc   : > { %v1418_v53 = vadd.f32 %v1378_v39, %v4564_v31  ;;  %v1475_v39 = vpop.f32.mrf.mxu3 }
 0x2ce   : > { %v1450_v51 = vmax.f32 %v1418_v53, 0.0  ;;  %v4570_v53 = vld [vmem:[#allocation35_spill] sm:$0xff] }
 0x2d0   : > { %1768 = vmatpush.msra.mxu1 %v1450_v51 }
 0x2d2   : > { %1769 = vmatpush.msra.mxu1 %v1449_v13  ;;  %v4571_v13 = vld [vmem:[#allocation17_spill] sm:$0xff] }
 0x2d3   : > { %v1381_v33 = vpop.f32.mrf.mxu2  ;;  %3244 = vmatmul.msk.f32.vlgmr.msra.gmra.mxu1 %vm773_vm1, %v4565_v20 }
 0x2d4   : > { %v1419_v25 = vadd.f32 %v1381_v33, %v4567_v6  ;;  %v1518_v20 = vpop.f32.mrf.mxu3  ;;  %v4573_v33 = vld [vmem:[#allocation11_spill] sm:$0xff] }
 0x2d6   : > { %v1451_v21 = vmax.f32 %v1419_v25, 0.0  ;;  %v4575_v25 = vld [vmem:[#allocation36_spill] sm:$0xff] }
 0x2db   : > { %v1383_v14 = vpop.f32.mrf.mxu2  ;;  %3245 = vmatmul.msk.f32.gmra.mxu1 %vm773_vm1, %v4566_v58  ;;  %v4572_v58 = vld [vmem:[#allocation19_spill] sm:$0xff] }
 0x2dc   : > { %v1420_v4 = vadd.f32 %v1383_v14, %v4568_v62  ;;  %v4574_v14 = vld [vmem:[#allocation9_spill] sm:$0xff] }
 0x2de   : > { %v1452_v54 = vmax.f32 %v1420_v4, 0.0 }
 0x2e0   : > { %1791 = vmatpush.msra.mxu3 %v1452_v54  ;;  %v4576_v54 = vld [vmem:[#allocation22_spill] sm:$0xff] }
 0x2e2   : > { %1792 = vmatpush.msra.mxu3 %v1451_v21 }
 0x2e3   : > { %v1386_v51 = vpop.f32.mrf.mxu2  ;;  %3246 = vmatmul.msk.f32.vlgmr.msra.gmra.mxu3 %vm773_vm1, %v4570_v53  ;;  %v1521_v53 = vpop.f32.mrf.mxu3 }
 0x2e4   : > { %1839 = vmatpush.bf16.msrb.mxu3 %v4569_v24  ;;  %v1421_v6 = vadd.f32 %v1386_v51, %v4573_v33  ;;  %v4577_v24 = vld [vmem:[#allocation26_spill] sm:$0xff]  ;;  %v1825_v11 = vpack.c.bf16 %v1521_v53, %v1518_v20 }
 0x2e5   : > { %v4580_v33 = vld [vmem:[#allocation30_spill] sm:$0xff] }
 0x2e6   : > { %v1453_v62 = vmax.f32 %v1421_v6, 0.0 }
 0x2e8   : > { %1840 = vmatpush.bf16.msrb.mxu3 %v4571_v13  ;;  %v4578_v13 = vld [vmem:[#allocation37_spill] sm:$0xff] }
 0x2eb   : > { %v1388_v31 = vpop.f32.mrf.mxu2  ;;  %3247 = vmatmul.msk.f32.gmra.mxu3 %vm773_vm1, %v4575_v25  ;;  %v1564_v51 = vpop.f32.mrf.mxu3 }
 0x2ec   : > { %1841 = vmatpush.bf16.msrb.mxu3 %v4572_v58  ;;  %v1422_v4 = vadd.f32 %v1388_v31, %v4574_v14  ;;  %v4579_v58 = vld [vmem:[#allocation28_spill] sm:$0xff]  ;;  %v4581_v31 = vld [vmem:[#allocation38_spill] sm:$0xff]  ;;  %v1823_v14 = vpack.c.bf16 %v1475_v39, %v1472_v2 }
 0x2ee   : > { %v1454_v21 = vmax.f32 %v1422_v4, 0.0  ;;  %v4582_v4 = vld [vmem:[#allocation31_spill] sm:$0xff] }
 0x2f0   : > { %1842 = vmatpush.bf16.msrb.mxu3 %v4576_v54  ;;  %1814 = vmatpush.msrb.mxu1 %v1454_v21 }
 0x2f2   : > { %1815 = vmatpush.msrb.mxu1 %v1453_v62  ;;  %v1495_v62 = vpop.f32.mrf.mxu1 }
 0x2f3   : > { %3248 = vmatmul.msk.f32.vlgmr.msrb.gmra.mxu1 %vm773_vm1, %v4578_v13  ;;  %v1567_v6 = vpop.f32.mrf.mxu3 }
 0x2f4   : > { %1843 = vmatpush.bf16.msrb.mxu3 %v4577_v24  ;;  %v1827_v2 = vpack.c.bf16 %v1567_v6, %v1564_v51 }
 0x2f8   : > { %1844 = vmatpush.bf16.msrb.mxu3 %v4579_v58 }
 0x2fa   : > { %v1498_v25 = vpop.f32.mrf.mxu1 }
 0x2fb   : > { %3249 = vmatmul.msk.f32.gmra.mxu1 %vm773_vm1, %v4581_v31  ;;  %v1610_v21 = vpop.f32.mrf.mxu3  ;;  %v1824_v24 = vpack.c.bf16 %v1498_v25, %v1495_v62 }
 0x2fc   : > { %1845 = vmatpush.bf16.msrb.mxu3 %v4580_v33 }
 0x300   : > { %1846 = vmatpush.bf16.msrb.mxu3 %v4582_v4 }
 0x302   : > { %v1541_v12 = vpop.f32.mrf.mxu1 }
 0x303   : > { %1847 = vmatmul.bf16.vlgmr.msrb.gmra.mxu3 %v1823_v14  ;;  %v1613_v54 = vpop.f32.mrf.mxu3 }
 0x30a   : > { %v1544_v8 = vpop.f32.mrf.mxu1 }
 0x30b   : > { %v1656_v13 = vpop.f32.mrf.mxu3  ;;  %v1826_v61 = vpack.c.bf16 %v1544_v8, %v1541_v12 }
 0x312   : > { %v1587_v39 = vpop.f32.mrf.mxu1 }
 0x313   : > { %1852 = vmatmul.bf16.gmra.mxu3 %v1824_v24  ;;  %v1659_v58 = vpop.f32.mrf.mxu3  ;;  %v1829_v24 = vpack.c.bf16 %v1613_v54, %v1610_v21 }
 0x31a   : > { %v1590_v14 = vpop.f32.mrf.mxu1 }
 0x31b   : > { %v1828_v47 = vpack.c.bf16 %v1590_v14, %v1587_v39 }
 0x322   : > { %v1633_v62 = vpop.f32.mrf.mxu1 }
 0x323   : > { %1857 = vmatmul.bf16.gmra.mxu3 %v1825_v11 }
 0x326   : > { %v1702_v33 = vpop.f32.mrf.mxu3 }
 0x32a   : > { %v1636_v11 = vpop.f32.mrf.mxu1 }
 0x32b   : > { %v1830_v53 = vpack.c.bf16 %v1636_v11, %v1633_v62 }
 0x32e   : > { %v1705_v31 = vpop.f32.mrf.mxu3 }
 0x32f   : > { %v1833_v4 = vpack.c.bf16 %v1705_v31, %v1702_v33 }
 0x332   : > { %v1679_v12 = vpop.f32.mrf.mxu1 }
 0x333   : > { %1862 = vmatmul.bf16.gmra.mxu3 %v1826_v61  ;;  %v1831_v61 = vpack.c.bf16 %v1659_v58, %v1656_v13 }
 0x33a   : > { %v1682_v31 = vpop.f32.mrf.mxu1 }
 0x33b   : > { %v1832_v21 = vpack.c.bf16 %v1682_v31, %v1679_v12 }
 0x342   : > { %v1725_v11 = vpop.f32.mrf.mxu1 }
 0x343   : > { %1867 = vmatmul.bf16.gmra.mxu3 %v1827_v2 }
 0x346   : > { %v1748_v25 = vpop.f32.mrf.mxu3 }
 0x34e   : > { %v1751_v20 = vpop.f32.mrf.mxu3 }
 0x353   : > { %1872 = vmatmul.bf16.gmra.mxu3 %v1828_v47 }
 0x363   : > { %1877 = vmatmul.bf16.gmra.mxu3 %v1829_v24 }
 0x366   : > { %v4143_v41 = vpop.f32.mrf.mxu3 }
 0x36e   : > { %v4145_v8 = vpop.f32.mrf.mxu3 }
 0x373   : > { %1882 = vmatmul.bf16.gmra.mxu3 %v1830_v53 }
 0x383   : > { %1887 = vmatmul.bf16.gmra.mxu3 %v1831_v61 }
 0x386   : > { %v1848_v33 = vpop.f32.mrf.mxu3 }
 0x387   : > { %v1928_v47 = vadd.f32 %v1848_v33, %v3708_v17 }
 0x389   : > { %v1960_v2 = vmax.f32 %v1928_v47, 0.0 }
 0x38e   : > { %v1850_v51 = vpop.f32.mrf.mxu3 }
 0x38f   : > { %v1929_v54 = vadd.f32 %v1850_v51, %v3706_v16 }
 0x391   : > { %v1961_v6 = vmax.f32 %v1929_v54, 0.0  ;;  %v1835_v54 = vpack.c.bf16 %v1751_v20, %v1748_v25 }
 0x393   : > { %1892 = vmatmul.bf16.gmra.mxu3 %v1832_v21  ;;  %2006 = vmatpush.msra.mxu1 %v1961_v6 }
 0x395   : > { %2007 = vmatpush.msra.mxu1 %v1960_v2 }
 0x396   : > { %v1853_v39 = vpop.f32.mrf.mxu3  ;;  %3250 = vmatmul.msk.f32.vlgmr.msra.gmra.mxu1 %vm773_vm1, %v3754_v32  ;;  %v1728_v32 = vpop.f32.mrf.mxu1 }
 0x397   : > { %v1930_v13 = vadd.f32 %v1853_v39, %v3723_v23  ;;  %v1834_v51 = vpack.c.bf16 %v1728_v32, %v1725_v11  ;;  %v1837_v11 = vpack.c.bf16 %v4145_v8, %v4143_v41 }
 0x399   : > { %v1962_v62 = vmax.f32 %v1930_v13, 0.0 }
 0x39e   : > { %v1855_v58 = vpop.f32.mrf.mxu3  ;;  %3251 = vmatmul.msk.f32.gmra.mxu1 %vm773_vm1, %v3739_v28  ;;  %v1771_v2 = vpop.f32.mrf.mxu1 }
 0x39f   : > { %v1931_v14 = vadd.f32 %v1855_v58, %v3721_v22 }
 0x3a1   : > { %v1963_v24 = vmax.f32 %v1931_v14, 0.0 }
 0x3a3   : > { %1897 = vmatmul.bf16.gmra.mxu3 %v1833_v4  ;;  %2029 = vmatpush.msrb.mxu1 %v1963_v24 }
 0x3a5   : > { %2030 = vmatpush.msrb.mxu1 %v1962_v62 }
 0x3a6   : > { %v1858_v53 = vpop.f32.mrf.mxu3  ;;  %3252 = vmatmul.msk.f32.vlgmr.msrb.gmra.mxu1 %vm773_vm1, %v3742_v29 }
 0x3a7   : > { %v1932_v28 = vadd.f32 %v1858_v53, %v3748_v30 }
 0x3a9   : > { %v1964_v31 = vmax.f32 %v1932_v28, 0.0 }
 0x3ae   : > { %v1860_v61 = vpop.f32.mrf.mxu3  ;;  %3253 = vmatmul.msk.f32.gmra.mxu1 %vm773_vm1, %v3759_v34 }
 0x3af   : > { %v1933_v12 = vadd.f32 %v1860_v61, %v3736_v27 }
 0x3b1   : > { %v1965_v33 = vmax.f32 %v1933_v12, 0.0 }
 0x3b3   : > { %1902 = vmatmul.bf16.gmra.mxu3 %v1834_v51  ;;  %2052 = vmatpush.msra.mxu1 %v1965_v33 }
 0x3b5   : > { %2053 = vmatpush.msra.mxu1 %v1964_v31 }
 0x3b6   : > { %v1863_v4 = vpop.f32.mrf.mxu3  ;;  %3254 = vmatmul.msk.f32.vlgmr.msra.gmra.mxu1 %vm773_vm1, %v3767_v37 }
 0x3b7   : > { %v1934_v34 = vadd.f32 %v1863_v4, %v3771_v38 }
 0x3b9   : > { %v1966_v21 = vmax.f32 %v1934_v34, 0.0 }
 0x3be   : > { %v1865_v29 = vpop.f32.mrf.mxu3  ;;  %3255 = vmatmul.msk.f32.gmra.mxu1 %vm773_vm1, %v3776_v40  ;;  %v1774_v40 = vpop.f32.mrf.mxu1 }
 0x3bf   : > { %v1935_v47 = vadd.f32 %v1865_v29, %v3764_v36  ;;  %v1836_v13 = vpack.c.bf16 %v1774_v40, %v1771_v2 }
 0x3c1   : > { %v1967_v6 = vmax.f32 %v1935_v47, 0.0 }
 0x3c3   : > { %1907 = vmatmul.bf16.gmra.mxu3 %v1835_v54  ;;  %2075 = vmatpush.msrb.mxu0 %v1967_v6 }
 0x3c4   : > { %3408 = vmatpush.msra.mxu2 %v1967_v6 }
 0x3c5   : > { %2076 = vmatpush.msrb.mxu0 %v1966_v21 }
 0x3c6   : > { %3409 = vmatpush.msra.mxu2 %v1966_v21  ;;  %v1868_v39 = vpop.f32.mrf.mxu3  ;;  %3256 = vmatmul.msk.f32.vlgmr.msrb.gmra.mxu0 %vm773_vm1, %v3787_v44  ;;  %v1817_v61 = vpop.f32.mrf.mxu1 }
 0x3c7   : > { %3257 = vmatmul.msk.f32.vlgmr.msra.gmra.mxu2 %vm773_vm1, %v3792_v46  ;;  %v1936_v58 = vadd.f32 %v1868_v39, %v3782_v43 }
 0x3c9   : > { %v1968_v14 = vmax.f32 %v1936_v58, 0.0 }
 0x3ce   : > { %v1870_v37 = vpop.f32.mrf.mxu3 }
 0x3cf   : > { %v1937_v25 = vadd.f32 %v1870_v37, %v3780_v42 }
 0x3d1   : > { %v1969_v20 = vmax.f32 %v1937_v25, 0.0 }
 0x3d3   : > { %1912 = vmatmul.bf16.gmra.mxu3 %v1836_v13  ;;  %2098 = vmatpush.msrb.mxu1 %v1969_v20  ;;  %v4583_v20 = vld [vmem:[#allocation12_spill] sm:$0xff] }
 0x3d5   : > { %2099 = vmatpush.msrb.mxu1 %v1968_v14 }
 0x3d6   : > { %v1873_v24 = vpop.f32.mrf.mxu3  ;;  %3258 = vmatmul.msk.f32.vlgmr.msrb.gmra.mxu1 %vm773_vm1, %v3799_v49  ;;  %v1820_v49 = vpop.f32.mrf.mxu1 }
 0x3d7   : > { %v1938_v46 = vadd.f32 %v1873_v24, %v3803_v50  ;;  %v1838_v41 = vpack.c.bf16 %v1820_v49, %v1817_v61  ;;  %v4588_v49 = vld [vmem:[#allocation27_spill] sm:$0xff] }
 0x3d9   : > { %v1970_v32 = vmax.f32 %v1938_v46, 0.0 }
 0x3de   : > { %v1875_v44 = vpop.f32.mrf.mxu3  ;;  %3259 = vmatmul.msk.f32.gmra.mxu1 %vm773_vm1, %v3808_v52 }
 0x3df   : > { %v1939_v62 = vadd.f32 %v1875_v44, %v3796_v48  ;;  %v4584_v44 = vld [vmem:[#allocation13_spill] sm:$0xff] }
 0x3e1   : > { %v1971_v53 = vmax.f32 %v1939_v62, 0.0  ;;  %v4585_v62 = vld [vmem:[#allocation18_spill] sm:$0xff] }
 0x3e3   : > { %1917 = vmatmul.bf16.gmra.mxu3 %v1837_v11  ;;  %2121 = vmatpush.msra.mxu0 %v1971_v53  ;;  %v4587_v53 = vld [vmem:[#allocation21_spill] sm:$0xff] }
 0x3e5   : > { %2122 = vmatpush.msra.mxu0 %v1970_v32 }
 0x3e6   : > { %v1878_v28 = vpop.f32.mrf.mxu3  ;;  %3260 = vmatmul.msk.f32.vlgmr.msra.gmra.mxu0 %vm773_vm1, %v3815_v56 }
 0x3e7   : > { %v1940_v52 = vadd.f32 %v1878_v28, %v3819_v57 }
 0x3e9   : > { %v1972_v51 = vmax.f32 %v1940_v52, 0.0  ;;  %v4589_v52 = vld [vmem:[#allocation32_spill] sm:$0xff] }
 0x3ee   : > { %v1880_v12 = vpop.f32.mrf.mxu3  ;;  %3261 = vmatmul.msk.f32.gmra.mxu0 %vm773_vm1, %v3824_v60 }
 0x3ef   : > { %v1941_v33 = vadd.f32 %v1880_v12, %v3812_v55 }
 0x3f1   : > { %v1973_v8 = vmax.f32 %v1941_v33, 0.0  ;;  %v4590_v33 = vld [vmem:[#allocation10_spill] sm:$0xff] }
 0x3f3   : > { %1922 = vmatmul.bf16.gmra.mxu3 %v1838_v41  ;;  %2144 = vmatpush.msra.mxu1 %v1973_v8  ;;  %v4591_v8 = vld [vmem:[#allocation8_spill] sm:$0xff] }
 0x3f5   : > { %2145 = vmatpush.msra.mxu1 %v1972_v51 }
 0x3f6   : > { %v1883_v31 = vpop.f32.mrf.mxu3  ;;  %3262 = vmatmul.msk.f32.vlgmr.msra.gmra.mxu1 %vm773_vm1, %v3838_v3 }
 0x3f7   : > { %v1942_v60 = vadd.f32 %v1883_v31, %v3830_v0 }
 0x3f9   : > { %v1974_v34 = vmax.f32 %v1942_v60, 0.0 }
 0x3fe   : > { %v1885_v56 = vpop.f32.mrf.mxu3  ;;  %3263 = vmatmul.msk.f32.gmra.mxu1 %vm773_vm1, %v3850_v7 }
 0x3ff   : > { %v1943_v4 = vadd.f32 %v1885_v56, %v3828_v63 }
 0x401   : > { %v1975_v29 = vmax.f32 %v1943_v4, 0.0  ;;  %v4592_v4 = vld [vmem:[#allocation33_spill] sm:$0xff] }
 0x403   : > { %2167 = vmatpush.msrb.mxu0 %v1975_v29 }
 0x405   : > { %2168 = vmatpush.msrb.mxu0 %v1974_v34  ;;  %v4593_v34 = vld [vmem:[#allocation34_spill] sm:$0xff] }
 0x406   : > { %v1888_v47 = vpop.f32.mrf.mxu3  ;;  %3264 = vmatmul.msk.f32.vlgmr.msrb.gmra.mxu0 %vm773_vm1, %v3834_v1 }
 0x407   : > { %v1944_v3 = vadd.f32 %v1888_v47, %v3856_v10  ;;  %v4594_v47 = vld [vmem:[#allocation16_spill] sm:$0xff] }
 0x409   : > { %v1976_v21 = vmax.f32 %v1944_v3, 0.0  ;;  %v4595_v3 = vld [vmem:[#allocation14_spill] sm:$0xff] }
 0x40e   : > { %v1890_v54 = vpop.f32.mrf.mxu3  ;;  %3265 = vmatmul.msk.f32.gmra.mxu0 %vm773_vm1, %v3845_v5 }
 0x40f   : > { %v1945_v7 = vadd.f32 %v1890_v54, %v3854_v9 }
 0x411   : > { %v1977_v6 = vmax.f32 %v1945_v7, 0.0 }
 0x413   : > { %2190 = vmatpush.msrb.mxu1 %v1977_v6 }
 0x415   : > { %2191 = vmatpush.msrb.mxu1 %v1976_v21 }
 0x416   : > { %v1893_v2 = vpop.f32.mrf.mxu3  ;;  %3266 = vmatmul.msk.f32.vlgmr.msrb.gmra.mxu1 %vm773_vm1, %v3863_v18 }
 0x417   : > { %v1946_v1 = vadd.f32 %v1893_v2, %v3865_v19 }
 0x419   : > { %v1978_v40 = vmax.f32 %v1946_v1, 0.0  ;;  %v4597_v1 = vld [vmem:[#allocation24_spill] sm:$0xff] }
 0x41e   : > { %v1895_v39 = vpop.f32.mrf.mxu3  ;;  %3267 = vmatmul.msk.f32.gmra.mxu1 %vm773_vm1, %v3888_v35 }
 0x41f   : > { %v1947_v5 = vadd.f32 %v1895_v39, %v3860_v15  ;;  %v4596_v39 = vld [vmem:[#allocation15_spill] sm:$0xff] }
 0x421   : > { %v1979_v37 = vmax.f32 %v1947_v5, 0.0  ;;  %v4598_v5 = vld [vmem:[#allocation17_spill] sm:$0xff] }
 0x423   : > { %2213 = vmatpush.msra.mxu0 %v1979_v37 }
 0x425   : > { %2214 = vmatpush.msra.mxu0 %v1978_v40  ;;  %v4599_v40 = vld [vmem:[#allocation19_spill] sm:$0xff] }
 0x426   : > { %v1898_v58 = vpop.f32.mrf.mxu3  ;;  %3268 = vmatmul.msk.f32.vlgmr.msra.gmra.mxu0 %vm773_vm1, %v3879_v26  ;;  %v4586_v26 = vld [vmem:[#allocation20_spill] sm:$0xff] }
 0x427   : > { %v1948_v18 = vadd.f32 %v1898_v58, %v3895_v45  ;;  %v2009_v58 = vpop.f32.mrf.mxu1 }
 0x429   : > { %v1980_v14 = vmax.f32 %v1948_v18, 0.0 }
 0x42e   : > { %v1900_v25 = vpop.f32.mrf.mxu3  ;;  %3269 = vmatmul.msk.f32.gmra.mxu0 %vm773_vm1, %v3916_v59 }
 0x42f   : > { %v1949_v35 = vadd.f32 %v1900_v25, %v4583_v20  ;;  %v4600_v25 = vld [vmem:[#allocation25_spill] sm:$0xff] }
 0x431   : > { %v1981_v13 = vmax.f32 %v1949_v35, 0.0  ;;  %v4601_v35 = vld [vmem:[#allocation23_spill] sm:$0xff] }
 0x433   : > { %2236 = vmatpush.msra.mxu1 %v1981_v13 }
 0x435   : > { %2237 = vmatpush.msra.mxu1 %v1980_v14  ;;  %v4602_v14 = vld [vmem:[#allocation29_spill] sm:$0xff] }
 0x436   : > { %v1903_v24 = vpop.f32.mrf.mxu3  ;;  %3270 = vmatmul.msk.f32.vlgmr.msra.gmra.mxu1 %vm773_vm1, %v4584_v44  ;;  %v4603_v44 = vld [vmem:[#allocation22_spill] sm:$0xff] }
 0x437   : > { %v1950_v11 = vadd.f32 %v1903_v24, %v4586_v26 }
 0x439   : > { %v1982_v32 = vmax.f32 %v1950_v11, 0.0  ;;  %v4604_v11 = vld [vmem:[#allocation26_spill] sm:$0xff] }
 0x43e   : > { %v1905_v46 = vpop.f32.mrf.mxu3  ;;  %3271 = vmatmul.msk.f32.gmra.mxu1 %vm773_vm1, %v4585_v62 }
 0x43f   : > { %v1951_v59 = vadd.f32 %v1905_v46, %v4587_v53 }
 0x441   : > { %v1983_v61 = vmax.f32 %v1951_v59, 0.0  ;;  %v4605_v59 = vld [vmem:[#allocation35_spill] sm:$0xff] }
 0x443   : > { %2259 = vmatpush.msrb.mxu0 %v1983_v61  ;;  %v2012_v61 = vpop.f32.mrf.mxu1 }
 0x445   : > { %2260 = vmatpush.msrb.mxu0 %v1982_v32  ;;  %v4606_v32 = vld [vmem:[#allocation28_spill] sm:$0xff] }
 0x446   : > { %v1908_v28 = vpop.f32.mrf.mxu3  ;;  %3272 = vmatmul.msk.f32.vlgmr.msrb.gmra.mxu0 %vm773_vm1, %v4588_v49  ;;  %v4607_v49 = vld [vmem:[#allocation30_spill] sm:$0xff] }
 0x447   : > { %v1952_v41 = vadd.f32 %v1908_v28, %v4590_v33 }
 0x449   : > { %v1984_v56 = vmax.f32 %v1952_v41, 0.0 }
 0x44e   : > { %v1910_v12 = vpop.f32.mrf.mxu3  ;;  %3273 = vmatmul.msk.f32.gmra.mxu0 %vm773_vm1, %v4589_v52  ;;  %v4609_v52 = vld [vmem:[#allocation11_spill] sm:$0xff] }
 0x44f   : > { %v1953_v51 = vadd.f32 %v1910_v12, %v4591_v8  ;;  %v4608_v12 = vld [vmem:[#allocation36_spill] sm:$0xff] }
 0x451   : > { %v1985_v31 = vmax.f32 %v1953_v51, 0.0  ;;  %v4610_v51 = vld [vmem:[#allocation9_spill] sm:$0xff] }
 0x453   : > { %2282 = vmatpush.msrb.mxu1 %v1985_v31 }
 0x455   : > { %2283 = vmatpush.msrb.mxu1 %v1984_v56 }
 0x456   : > { %v1913_v60 = vpop.f32.mrf.mxu3  ;;  %3274 = vmatmul.msk.f32.vlgmr.msrb.gmra.mxu1 %vm773_vm1, %v4592_v4  ;;  %v2032_v4 = vpop.f32.mrf.mxu1 }
 0x457   : > { %v1954_v54 = vadd.f32 %v1913_v60, %v4594_v47  ;;  %v4611_v60 = vld [vmem:[#allocation31_spill] sm:$0xff] }
 0x459   : > { %v1986_v21 = vmax.f32 %v1954_v54, 0.0  ;;  %v4612_v54 = vld [vmem:[#allocation37_spill] sm:$0xff] }
 0x45e   : > { %v1915_v29 = vpop.f32.mrf.mxu3  ;;  %3275 = vmatmul.msk.f32.gmra.mxu1 %vm773_vm1, %v4593_v34  ;;  %v2360_v34 = vpack.c.bf16 %v2012_v61, %v2009_v58  ;;  %v2081_v58 = vpop.f32.mrf.mxu2 }
 0x45f   : > { %v1955_v7 = vadd.f32 %v1915_v29, %v4595_v3 }
 0x461   : > { %v1987_v6 = vmax.f32 %v1955_v7, 0.0  ;;  %v2035_v7 = vpop.f32.mrf.mxu1 }
 0x463   : > { %2305 = vmatpush.msra.mxu0 %v1987_v6  ;;  %v4613_v6 = vld [vmem:[#allocation38_spill] sm:$0xff] }
 0x465   : > { %2306 = vmatpush.msra.mxu0 %v1986_v21  ;;  %v2361_v21 = vpack.c.bf16 %v2035_v7, %v2032_v4  ;;  %v3388_v4 = vld [vmem:[%s4453_s5 + $0x10] sm:$0xff] }
 0x466   : > { %v1918_v2 = vpop.f32.mrf.mxu3  ;;  %3276 = vmatmul.msk.f32.vlgmr.msra.gmra.mxu0 %vm773_vm1, %v4597_v1 }
 0x467   : > { %2376 = vmatpush.bf16.msrb.mxu0 %v4596_v39  ;;  %v1956_v18 = vadd.f32 %v1918_v2, %v4600_v25  ;;  %v2078_v39 = vpop.f32.mrf.mxu0 }
 0x469   : > { %v1988_v46 = vmax.f32 %v1956_v18, 0.0  ;;  %v2055_v2 = vpop.f32.mrf.mxu1  ;;  %v2363_v18 = vpack.c.bf16 %v2081_v58, %v2078_v39 }
 0x46b   : > { %2377 = vmatpush.bf16.msrb.mxu0 %v4598_v5 }
 0x46e   : > { %v1920_v37 = vpop.f32.mrf.mxu3  ;;  %3277 = vmatmul.msk.f32.gmra.mxu0 %vm773_vm1, %v4602_v14 }
 0x46f   : > { %2378 = vmatpush.bf16.msrb.mxu0 %v4599_v40  ;;  %v1957_v13 = vadd.f32 %v1920_v37, %v4601_v35  ;;  %v2124_v5 = vpop.f32.mrf.mxu0 }
 0x471   : > { %v1989_v24 = vmax.f32 %v1957_v13, 0.0  ;;  %v2058_v1 = vpop.f32.mrf.mxu1 }
 0x472   : > { %v2362_v37 = vpack.c.bf16 %v2058_v1, %v2055_v2 }
 0x473   : > { %2379 = vmatpush.bf16.msrb.mxu0 %v4603_v44  ;;  %2328 = vmatpush.msra.mxu1 %v1989_v24 }
 0x475   : > { %2329 = vmatpush.msra.mxu1 %v1988_v46 }
 0x476   : > { %v1923_v62 = vpop.f32.mrf.mxu3  ;;  %3278 = vmatmul.msk.f32.vlgmr.msra.gmra.mxu1 %vm773_vm1, %v4605_v59 }
 0x477   : > { %2380 = vmatpush.bf16.msrb.mxu0 %v4604_v11  ;;  %v1958_v41 = vadd.f32 %v1923_v62, %v4609_v52  ;;  %v2127_v40 = vpop.f32.mrf.mxu0  ;;  %v3393_v62 = vld [vmem:[%s4453_s5 + $0x38] sm:$0xff] }
 0x478   : > { %2593 = vmatpush.bf16.msrb.mxu1 %v3393_v62  ;;  %v2365_v61 = vpack.c.bf16 %v2127_v40, %v2124_v5 }
 0x479   : > { %v1990_v29 = vmax.f32 %v1958_v41, 0.0  ;;  %v2101_v14 = vpop.f32.mrf.mxu1 }
 0x47b   : > { %2381 = vmatpush.bf16.msrb.mxu0 %v4606_v32  ;;  %v3392_v32 = vld [vmem:[%s4453_s5 + $0x30] sm:$0xff] }
 0x47c   : > { %2594 = vmatpush.bf16.msrb.mxu1 %v3392_v32 }
 0x47e   : > { %v1925_v28 = vpop.f32.mrf.mxu3  ;;  %3279 = vmatmul.msk.f32.gmra.mxu1 %vm773_vm1, %v4608_v12  ;;  %v3390_v12 = vld [vmem:[%s4453_s5 + $0x20] sm:$0xff] }
 0x47f   : > { %2382 = vmatpush.bf16.msrb.mxu0 %v4607_v49  ;;  %v1959_v31 = vadd.f32 %v1925_v28, %v4610_v51  ;;  %v3391_v49 = vld [vmem:[%s4453_s5 + $0x28] sm:$0xff] }
 0x480   : > { %2595 = vmatpush.bf16.msrb.mxu1 %v3391_v49 }
 0x481   : > { %v1991_v56 = vmax.f32 %v1959_v31, 0.0  ;;  %v2104_v44 = vpop.f32.mrf.mxu1 }
 0x482   : > { %v2364_v46 = vpack.c.bf16 %v2104_v44, %v2101_v14 }
 0x483   : > { %2383 = vmatpush.bf16.msrb.mxu0 %v4611_v60  ;;  %2351 = vmatpush.msrb.mxu2 %v1991_v56  ;;  %v2170_v13 = vpop.f32.mrf.mxu0  ;;  %v3389_v56 = vld [vmem:[%s4453_s5 + $0x18] sm:$0xff] }
 0x484   : > { %2596 = vmatpush.bf16.msrb.mxu1 %v3390_v12 }
 0x485   : > { %2352 = vmatpush.msrb.mxu2 %v1990_v29 }
 0x486   : > { %2384 = vmatmul.bf16.vlgmr.msrb.gmra.mxu0 %v2360_v34  ;;  %3280 = vmatmul.msk.f32.vlgmr.msrb.gmra.mxu2 %vm773_vm1, %v4612_v54  ;;  %v3387_v34 = vld [vmem:[%s4453_s5 + $0x8] sm:$0xff]  ;;  %v3386_v54 = vld [vmem:[%s4453_s5] sm:$0xff] }
 0x487   : > { %3410 = vmatpush.bf16.msra.mxu2 %v3393_v62 }
 0x488   : > { %2597 = vmatpush.bf16.msrb.mxu1 %v3389_v56 }
 0x489   : > { %v2147_v28 = vpop.f32.mrf.mxu1 }
 0x48b   : > { %v2173_v24 = vpop.f32.mrf.mxu0  ;;  %3411 = vmatpush.bf16.msra.mxu2 %v3392_v32 }
 0x48c   : > { %2598 = vmatpush.bf16.msrb.mxu1 %v3388_v4 }
 0x48e   : > { %3281 = vmatmul.msk.f32.gmra.mxu2 %vm773_vm1, %v4613_v6  ;;  %v2367_v6 = vpack.c.bf16 %v2173_v24, %v2170_v13 }
 0x48f   : > { %3412 = vmatpush.bf16.msra.mxu2 %v3391_v49 }
 0x490   : > { %2599 = vmatpush.bf16.msrb.mxu1 %v3387_v34 }
 0x491   : > { %v2150_v31 = vpop.f32.mrf.mxu1 }
 0x492   : > { %v2366_v60 = vpack.c.bf16 %v2150_v31, %v2147_v28 }
 0x493   : > { %3413 = vmatpush.bf16.msra.mxu2 %v3390_v12 }
 0x494   : > { %2600 = vmatpush.bf16.msrb.mxu1 %v3386_v54 }
 0x496   : > { %2389 = vmatmul.bf16.gmra.mxu0 %v2361_v21 }
 0x497   : > { %3414 = vmatpush.bf16.msra.mxu2 %v3389_v56 }
 0x499   : > { %v2193_v21 = vpop.f32.mrf.mxu1 }
 0x49b   : > { %3415 = vmatpush.bf16.msra.mxu2 %v3388_v4 }
 0x49f   : > { %3416 = vmatpush.bf16.msra.mxu2 %v3387_v34 }
 0x4a1   : > { %v2196_v39 = vpop.f32.mrf.mxu1 }
 0x4a2   : > { %v2368_v5 = vpack.c.bf16 %v2196_v39, %v2193_v21 }
 0x4a3   : > { %v2216_v11 = vpop.f32.mrf.mxu0  ;;  %3417 = vmatpush.bf16.msra.mxu2 %v3386_v54 }
 0x4a6   : > { %2394 = vmatmul.bf16.gmra.mxu0 %v2362_v37 }
 0x4ab   : > { %v2219_v59 = vpop.f32.mrf.mxu0 }
 0x4ac   : > { %v2369_v62 = vpack.c.bf16 %v2219_v59, %v2216_v11 }
 0x4b3   : > { %v2239_v13 = vpop.f32.mrf.mxu1 }
 0x4b6   : > { %2399 = vmatmul.bf16.gmra.mxu0 %v2363_v18 }
 0x4c3   : > { %v2262_v41 = vpop.f32.mrf.mxu0 }
 0x4c6   : > { %2404 = vmatmul.bf16.gmra.mxu0 %v2364_v46 }
 0x4cb   : > { %v2265_v29 = vpop.f32.mrf.mxu0 }
 0x4cc   : > { %v2371_v54 = vpack.c.bf16 %v2265_v29, %v2262_v41 }
 0x4d6   : > { %2409 = vmatmul.bf16.gmra.mxu0 %v2365_v61 }
 0x4e3   : > { %v2308_v7 = vpop.f32.mrf.mxu0 }
 0x4e6   : > { %2414 = vmatmul.bf16.gmra.mxu0 %v2366_v60 }
 0x4eb   : > { %v2311_v2 = vpop.f32.mrf.mxu0 }
 0x4f6   : > { %2419 = vmatmul.bf16.gmra.mxu0 %v2367_v6 }
 0x503   : > { %v2385_v1 = vpop.f32.mrf.mxu0 }
 0x504   : > { %v2465_v37 = vadd.f32 %v2385_v1, %v3708_v17  ;;  %v2242_v17 = vpop.f32.mrf.mxu1 }
 0x506   : > { %2424 = vmatmul.bf16.gmra.mxu0 %v2368_v5  ;;  %v2497_v18 = vmax.f32 %v2465_v37, 0.0 }
 0x50b   : > { %v2387_v40 = vpop.f32.mrf.mxu0 }
 0x50c   : > { %v2466_v58 = vadd.f32 %v2387_v40, %v3706_v16  ;;  %v2370_v16 = vpack.c.bf16 %v2242_v17, %v2239_v13 }
 0x50e   : > { %v2498_v14 = vmax.f32 %v2466_v58, 0.0 }
 0x510   : > { %v2529_v44 = vpack.c.bf16 %v2498_v14, %v2497_v18 }
 0x512   : > { %2601 = vmatmul.bf16.vlgmr.msrb.gmra.mxu1 %v2529_v44 }
 0x513   : > { %v2390_v46 = vpop.f32.mrf.mxu0 }
 0x514   : > { %v2467_v24 = vadd.f32 %v2390_v46, %v3723_v23  ;;  %v2373_v46 = vpack.c.bf16 %v2311_v2, %v2308_v7 }
 0x516   : > { %2429 = vmatmul.bf16.gmra.mxu0 %v2369_v62  ;;  %v2499_v28 = vmax.f32 %v2467_v24, 0.0 }
 0x51b   : > { %v2392_v61 = vpop.f32.mrf.mxu0 }
 0x51c   : > { %v2468_v32 = vadd.f32 %v2392_v61, %v3721_v22  ;;  %v2285_v22 = vpop.f32.mrf.mxu1 }
 0x51e   : > { %v2500_v49 = vmax.f32 %v2468_v32, 0.0 }
 0x520   : > { %v2530_v12 = vpack.c.bf16 %v2500_v49, %v2499_v28 }
 0x522   : > { %2606 = vmatmul.bf16.gmra.mxu1 %v2530_v12  ;;  %v2354_v12 = vpop.f32.mrf.mxu2 }
 0x523   : > { %v2395_v31 = vpop.f32.mrf.mxu0 }
 0x524   : > { %v2469_v56 = vadd.f32 %v2395_v31, %v3748_v30  ;;  %v2288_v30 = vpop.f32.mrf.mxu1 }
 0x526   : > { %2434 = vmatmul.bf16.gmra.mxu0 %v2370_v16  ;;  %v2501_v59 = vmax.f32 %v2469_v56, 0.0 }
 0x52a   : > { %v2357_v56 = vpop.f32.mrf.mxu2 }
 0x52b   : > { %v2397_v60 = vpop.f32.mrf.mxu0 }
 0x52c   : > { %v2470_v11 = vadd.f32 %v2397_v60, %v3736_v27  ;;  %v2372_v27 = vpack.c.bf16 %v2288_v30, %v2285_v22  ;;  %v2375_v60 = vpack.c.bf16 %v2357_v56, %v2354_v12 }
 0x52e   : > { %v2502_v4 = vmax.f32 %v2470_v11, 0.0 }
 0x530   : > { %v2531_v34 = vpack.c.bf16 %v2502_v4, %v2501_v59 }
 0x532   : > { %2611 = vmatmul.bf16.gmra.mxu1 %v2531_v34 }
 0x533   : > { %v2400_v23 = vpop.f32.mrf.mxu0 }
 0x534   : > { %v2471_v6 = vadd.f32 %v2400_v23, %v3771_v38 }
 0x536   : > { %2439 = vmatmul.bf16.gmra.mxu0 %v2371_v54  ;;  %v2503_v1 = vmax.f32 %v2471_v6, 0.0 }
 0x53b   : > { %v2402_v21 = vpop.f32.mrf.mxu0 }
 0x53c   : > { %v2472_v39 = vadd.f32 %v2402_v21, %v3764_v36  ;;  %v2331_v36 = vpop.f32.mrf.mxu1 }
 0x53e   : > { %v2504_v5 = vmax.f32 %v2472_v39, 0.0 }
 0x540   : > { %v2532_v37 = vpack.c.bf16 %v2504_v5, %v2503_v1 }
 0x542   : > { %2616 = vmatmul.bf16.gmra.mxu1 %v2532_v37 }
 0x543   : > { %v2405_v40 = vpop.f32.mrf.mxu0 }
 0x544   : > { %v2473_v58 = vadd.f32 %v2405_v40, %v3782_v43  ;;  %v2334_v43 = vpop.f32.mrf.mxu1 }
 0x546   : > { %2444 = vmatmul.bf16.gmra.mxu0 %v2372_v27  ;;  %v2505_v29 = vmax.f32 %v2473_v58, 0.0 }
 0x54b   : > { %v2407_v18 = vpop.f32.mrf.mxu0 }
 0x54c   : > { %v2474_v41 = vadd.f32 %v2407_v18, %v3780_v42  ;;  %v2374_v42 = vpack.c.bf16 %v2334_v43, %v2331_v36 }
 0x54e   : > { %v2506_v14 = vmax.f32 %v2474_v41, 0.0 }
 0x550   : > { %v2533_v44 = vpack.c.bf16 %v2506_v14, %v2505_v29 }
 0x552   : > { %2621 = vmatmul.bf16.gmra.mxu1 %v2533_v44 }
 0x553   : > { %v2410_v38 = vpop.f32.mrf.mxu0 }
 0x554   : > { %v2475_v62 = vadd.f32 %v2410_v38, %v3803_v50 }
 0x556   : > { %2449 = vmatmul.bf16.gmra.mxu0 %v2373_v46  ;;  %v2507_v61 = vmax.f32 %v2475_v62, 0.0 }
 0x55b   : > { %v2412_v13 = vpop.f32.mrf.mxu0 }
 0x55c   : > { %v2476_v24 = vadd.f32 %v2412_v13, %v3796_v48 }
 0x55e   : > { %v2508_v32 = vmax.f32 %v2476_v24, 0.0 }
 0x560   : > { %v2534_v28 = vpack.c.bf16 %v2508_v32, %v2507_v61 }
 0x562   : > { %2626 = vmatmul.bf16.gmra.mxu1 %v2534_v28 }
 0x563   : > { %v2415_v49 = vpop.f32.mrf.mxu0 }
 0x564   : > { %v2477_v17 = vadd.f32 %v2415_v49, %v3819_v57 }
 0x566   : > { %2454 = vmatmul.bf16.gmra.mxu0 %v2374_v42  ;;  %v2509_v2 = vmax.f32 %v2477_v17, 0.0 }
 0x56b   : > { %v2417_v31 = vpop.f32.mrf.mxu0 }
 0x56c   : > { %v2478_v7 = vadd.f32 %v2417_v31, %v3812_v55 }
 0x56e   : > { %v2510_v16 = vmax.f32 %v2478_v7, 0.0 }
 0x570   : > { %v2535_v50 = vpack.c.bf16 %v2510_v16, %v2509_v2 }
 0x572   : > { %2631 = vmatmul.bf16.gmra.mxu1 %v2535_v50 }
 0x573   : > { %v2420_v48 = vpop.f32.mrf.mxu0 }
 0x574   : > { %v2479_v11 = vadd.f32 %v2420_v48, %v3830_v0 }
 0x576   : > { %2459 = vmatmul.bf16.gmra.mxu0 %v2375_v60  ;;  %v2511_v34 = vmax.f32 %v2479_v11, 0.0 }
 0x57b   : > { %v2422_v59 = vpop.f32.mrf.mxu0 }
 0x57c   : > { %v2480_v4 = vadd.f32 %v2422_v59, %v3828_v63 }
 0x57e   : > { %v2512_v23 = vmax.f32 %v2480_v4, 0.0 }
 0x580   : > { %v2536_v54 = vpack.c.bf16 %v2512_v23, %v2511_v34 }
 0x582   : > { %2636 = vmatmul.bf16.gmra.mxu1 %v2536_v54 }
 0x583   : > { %v2425_v57 = vpop.f32.mrf.mxu0 }
 0x584   : > { %v2481_v55 = vadd.f32 %v2425_v57, %v3856_v10 }
 0x586   : > { %v2513_v21 = vmax.f32 %v2481_v55, 0.0 }
 0x58b   : > { %v2427_v22 = vpop.f32.mrf.mxu0 }
 0x58c   : > { %v2482_v6 = vadd.f32 %v2427_v22, %v3854_v9 }
 0x58e   : > { %v2514_v39 = vmax.f32 %v2482_v6, 0.0 }
 0x58f   : > { %v4295_v1 = vpop.f32.mrf.mxu1 }
 0x590   : > { %v2537_v5 = vpack.c.bf16 %v2514_v39, %v2513_v21  ;;  %v509_v21 = vld [vmem:[%s375_s28] sm:$0xff] }
 0x591   : > { %v2760_v39 = vmax.f32 %v509_v21, 1.0 }
 0x592   : > { %2641 = vmatmul.bf16.gmra.mxu1 %v2537_v5 }
 0x593   : > { %v2430_v0 = vpop.f32.mrf.mxu0 }
 0x594   : > { %v2483_v63 = vadd.f32 %v2430_v0, %v3865_v19  ;;  %v3568_v0 = vmov 0  }
 0x595   : > { %3465 = vset.pattern.permute.xlu0 %v3568_v0  ;;  %3466 = vset.pattern.permute.xlu1 %v3568_v0 }
 0x596   : > { %v2515_v27 = vmax.f32 %v2483_v63, 0.0  ;;  %v2762_v63 = vmin.f32 %v2760_v39, 16.0  ;;  %2744 = vperm.xlu0 %3465, %v509_v21  }
 0x597   : > { %v4297_v37 = vpop.f32.mrf.mxu1 }
 0x598   : > { %3468 = vrcp.f32 %v2762_v63 }
 0x59b   : > { %v2432_v30 = vpop.f32.mrf.mxu0 }
 0x59c   : > { %v2484_v40 = vadd.f32 %v2432_v30, %v3860_v15 }
 0x59e   : > { %v2516_v58 = vmax.f32 %v2484_v40, 0.0 }
 0x59f   : > { %v4301_v10 = vpop.f32.mrf.mxu1 }
 0x5a0   : > { %v2538_v18 = vpack.c.bf16 %v2516_v58, %v2515_v27 }
 0x5a2   : > { %2646 = vmatmul.bf16.gmra.mxu1 %v2538_v18  ;;  %v510_v18 = vld [vmem:[%s375_s28 + $0x8] sm:$0xff]  ;;  %s2933_s28 = sshll.u32 %s2930_s27, 4  ;;  %s2934_s28 = int_to_ptr.hbm [resolvable:$true] %s2933_s28 }
 0x5a3   : > { %v2435_v9 = vpop.f32.mrf.mxu0  ;;  %2749 = vperm.xlu1 %3466, %v510_v18   ;;  %s3486_s29 = sshra.s32 %s2934_s28, 4  ;;  %s3487_s29 = int_to_ptr.hbm [resolvable:$true] %s3486_s29 }
 0x5a4   : > { %v2485_v29 = vadd.f32 %v2435_v9, %v3895_v45  ;;  %v2761_v9 = vmax.f32 %v510_v18, 1.0  ;;  %s3488_s23 = scalar_lea.hbm %s3487_s29, 16  ;;  %p3493_p2 = scmp.lt.s32.totalorder %s3487_s29, %s4457_s9 }
 0x5a5   : > { %p3489_p13 = scmp.ne.s32.totalorder %s3487_s29, %s3488_s23  ;;  %p3494_p3 = scmp.lt.s32.totalorder %s3492_s0, %s3488_s23 }
 0x5a6   : > { %v2517_v38 = vmax.f32 %v2485_v29, 0.0  ;;  %v3469_v29 = vpop.eup %3468 }
 0x5a7   : > { %v4303_v41 = vpop.f32.mrf.mxu1  ;;  %2768 = vperm.xlu0 %3465, %v3469_v29   ;;  %p3490_p0 = pnand %p3489_p13, %p3659_p5  ;;  %p3495_p4 = por %p3494_p3, %p3493_p2 }
 0x5a9   : > { %p3491_p1 = pneg %p3490_p0 }
 0x5ab   : > { %v2437_v14 = vpop.f32.mrf.mxu0  ;;  %p3496_p7 = pnand %p3495_p4, %p3491_p1 }
 0x5ac   : > { %v2486_v44 = vadd.f32 %v2437_v14, %v4583_v20 }
 0x5ae   : > { %v2518_v46 = vmax.f32 %v2486_v44, 0.0 }
 0x5af   : > { %v4307_v19 = vpop.f32.mrf.mxu1 }
 0x5b0   : > { %v2539_v36 = vpack.c.bf16 %v2518_v46, %v2517_v38 }
 0x5b2   : > { %2651 = vmatmul.bf16.gmra.mxu1 %v2539_v36 }
 0x5b3   : > { %v2440_v15 = vpop.f32.mrf.mxu0 }
 0x5b4   : > { %v2487_v13 = vadd.f32 %v2440_v15, %v4586_v26 }
 0x5b6   : > { %v2519_v32 = vmax.f32 %v2487_v13, 0.0 }
 0x5b7   : > { %v4309_v62 = vpop.f32.mrf.mxu1 }
 0x5bb   : > { %v2442_v24 = vpop.f32.mrf.mxu0 }
 0x5bc   : > { %v2488_v61 = vadd.f32 %v2442_v24, %v4587_v53 }
 0x5be   : > { %v2520_v28 = vmax.f32 %v2488_v61, 0.0 }
 0x5bf   : > { %v4313_v45 = vpop.f32.mrf.mxu1 }
 0x5c0   : > { %v2540_v43 = vpack.c.bf16 %v2520_v28, %v2519_v32  ;;  %v2688_v28 = vmax.f32 %v4313_v45, 0.0 }
 0x5c2   : > { %2656 = vmatmul.bf16.vlgmr.msra.gmra.mxu2 %v2540_v43  ;;  %v2687_v43 = vmax.f32 %v4309_v62, 0.0 }
 0x5c3   : > { %v2445_v20 = vpop.f32.mrf.mxu0 }
 0x5c4   : > { %v2489_v42 = vadd.f32 %v2445_v20, %v4590_v33  ;;  %v2686_v20 = vmax.f32 %v4307_v19, 0.0 }
 0x5c6   : > { %v2521_v31 = vmax.f32 %v2489_v42, 0.0  ;;  %v2685_v42 = vmax.f32 %v4303_v41, 0.0  ;;  %v2714_v41 = vlaneseq }
 0x5c7   : > { %v4315_v49 = vpop.f32.mrf.mxu1 }
 0x5c8   : > { %v2689_v32 = vmax.f32 %v4315_v49, 0.0  ;;  %v2682_v49 = vmax.f32 %v4295_v1, 0.0 }
 0x5cb   : > { %v2447_v12 = vpop.f32.mrf.mxu0 }
 0x5cc   : > { %v2490_v17 = vadd.f32 %v2447_v12, %v4591_v8  ;;  %v2684_v12 = vmax.f32 %v4301_v10, 0.0 }
 0x5ce   : > { %v2522_v7 = vmax.f32 %v2490_v17, 0.0  ;;  %v2683_v17 = vmax.f32 %v4297_v37, 0.0 }
 0x5cf   : > { %v4319_v26 = vpop.f32.mrf.mxu1 }
 0x5d0   : > { %v2541_v53 = vpack.c.bf16 %v2522_v7, %v2521_v31  ;;  %v2690_v61 = vmax.f32 %v4319_v26, 0.0 }
 0x5d2   : > { %2661 = vmatmul.bf16.gmra.mxu2 %v2541_v53 }
 0x5d3   : > { %v2450_v2 = vpop.f32.mrf.mxu0 }
 0x5d4   : > { %v2491_v50 = vadd.f32 %v2450_v2, %v4594_v47  ;;  %v2718_v2 = vshrl.u32 %v2714_v41, 7 }
 0x5d6   : > { %v2523_v60 = vmax.f32 %v2491_v50, 0.0  ;;  %v2720_v37 = vmul.u32 16, %v2718_v2 }
 0x5d7   : > { %v4321_v16 = vpop.f32.mrf.mxu1 }
 0x5d8   : > { %v2691_v24 = vmax.f32 %v4321_v16, 0.0  ;;  %v2715_v16 = vand.u32 127, %v2714_v41 }
 0x5da   : > { %v2722_v50 = vsub.s32 %v2715_v16, %v2720_v37 }
 0x5db   : > { %v2452_v56 = vpop.f32.mrf.mxu0 }
 0x5dc   : > { %v2492_v48 = vadd.f32 %v2452_v56, %v4595_v3  ;;  %v2738_v56 = vcvt.s32.f32 %v2722_v50  ;;  %vm2726_vm2 = vcmp.ge.s32.totalorder %v2722_v50, 0  ;;  %vm2730_vm3 = vcmp.lt.s32.totalorder %v2722_v50, 16 }
 0x5dd   : > { %vm2734_vm4 = vmand %vm2726_vm2, %vm2730_vm3 }
 0x5de   : > { %v2524_v33 = vmax.f32 %v2492_v48, 0.0 }
 0x5df   : > { %v2627_v11 = vpop.f32.mrf.mxu1 }
 0x5e0   : > { %v2542_v59 = vpack.c.bf16 %v2524_v33, %v2523_v60  ;;  %v2692_v13 = vmax.f32 %v2627_v11, 0.0  ;;  %v2719_v60 = vadd.s32 8, %v2718_v2 }
 0x5e2   : > { %2666 = vmatmul.bf16.gmra.mxu2 %v2542_v59  ;;  %v2721_v59 = vmul.u32 16, %v2719_v60 }
 0x5e3   : > { %v2455_v8 = vpop.f32.mrf.mxu0 }
 0x5e4   : > { %v2493_v34 = vadd.f32 %v2455_v8, %v4600_v25  ;;  %v2724_v8 = vsub.s32 %v2715_v16, %v2721_v59 }
 0x5e6   : > { %v2525_v57 = vmax.f32 %v2493_v34, 0.0  ;;  %vm2728_vm7 = vcmp.ge.s32.totalorder %v2724_v8, 0  ;;  %vm2732_vm8 = vcmp.lt.s32.totalorder %v2724_v8, 16 }
 0x5e7   : > { %v2629_v4 = vpop.f32.mrf.mxu1  ;;  %vm2736_vm9 = vmand %vm2728_vm7, %vm2732_vm8 }
 0x5e8   : > { %v2693_v15 = vmax.f32 %v2629_v4, 0.0  ;;  %v2740_v4 = vcvt.s32.f32 %v2724_v8 }
 0x5eb   : > { %v2457_v23 = vpop.f32.mrf.mxu0 }
 0x5ec   : > { %v2494_v54 = vadd.f32 %v2457_v23, %v4601_v35 }
 0x5ee   : > { %v2526_v55 = vmax.f32 %v2494_v54, 0.0 }
 0x5ef   : > { %v2632_v47 = vpop.f32.mrf.mxu1 }
 0x5f0   : > { %v2543_v22 = vpack.c.bf16 %v2526_v55, %v2525_v57  ;;  %v2694_v36 = vmax.f32 %v2632_v47, 0.0 }
 0x5f2   : > { %2671 = vmatmul.bf16.gmra.mxu2 %v2543_v22 }
 0x5f3   : > { %v2460_v3 = vpop.f32.mrf.mxu0 }
 0x5f4   : > { %v2495_v25 = vadd.f32 %v2460_v3, %v4609_v52  ;;  %v2763_v52 = vmin.f32 %v2761_v9, 16.0 }
 0x5f6   : > { %v2527_v30 = vmax.f32 %v2495_v25, 0.0  ;;  %3470 = vrcp.f32 %v2763_v52 }
 0x5f7   : > { %v2634_v6 = vpop.f32.mrf.mxu1 }
 0x5f8   : > { %v2695_v46 = vmax.f32 %v2634_v6, 0.0 }
 0x5fb   : > { %v2462_v5 = vpop.f32.mrf.mxu0 }
 0x5fc   : > { %v2496_v35 = vadd.f32 %v2462_v5, %v4610_v51  ;;  %v3471_v38 = vpop.eup %3470 }
 0x5fd   : > { %2773 = vperm.xlu1 %3466, %v3471_v38  }
 0x5fe   : > { %v2528_v40 = vmax.f32 %v2496_v35, 0.0 }
 0x5ff   : > { %v2637_v27 = vpop.f32.mrf.mxu1 }
 0x600   : > { %v2544_v58 = vpack.c.bf16 %v2528_v40, %v2527_v30  ;;  %v2696_v44 = vmax.f32 %v2637_v27, 0.0  ;;  %v2716_v40 = vadd.s32 128, %v2715_v16 }
 0x602   : > { %2676 = vmatmul.bf16.gmra.mxu2 %v2544_v58  ;;  %v2723_v18 = vsub.s32 %v2716_v40, %v2720_v37 }
 0x604   : > { %v2739_v52 = vcvt.s32.f32 %v2723_v18  ;;  %vm2727_vm12 = vcmp.ge.s32.totalorder %v2723_v18, 0  ;;  %vm2731_vm13 = vcmp.lt.s32.totalorder %v2723_v18, 16 }
 0x605   : > { %vm2735_vm14 = vmand %vm2727_vm12, %vm2731_vm13 }
 0x607   : > { %v2639_v14 = vpop.f32.mrf.mxu1 }
 0x608   : > { %v2697_v51 = vmax.f32 %v2639_v14, 0.0  ;;  %v4347_v10 = vpop.permute.xlu0 %2744 }
 0x609   : > { %vm2752_vm5 = vcmp.lt.f32.partialorder %v2738_v56, %v4347_v10  ;;  %vm2753_vm15 = vcmp.lt.f32.partialorder %v2739_v52, %v4347_v10 }
 0x60a   : > { %2780 = vmatpush.msrb.mxu2 %v2697_v51  ;;  %vm2756_vm6 = vmand %vm2734_vm4, %vm2752_vm5 }
 0x60b   : > { %vm2757_vm0 = vmand %vm2735_vm14, %vm2753_vm15 }
 0x60c   : > { %2781 = vmatpush.msrb.mxu2 %v2696_v44  ;;  %v2725_v44 = vsub.s32 %v2716_v40, %v2721_v59 }
 0x60e   : > { %2782 = vmatpush.msrb.mxu2 %v2695_v46  ;;  %v3401_v46 = vld [vmem:[%s4454_s6 + $0x38] sm:$0xff]  ;;  %vm2729_vm1 = vcmp.ge.s32.totalorder %v2725_v44, 0  ;;  %vm2733_vm2 = vcmp.lt.s32.totalorder %v2725_v44, 16 }
 0x60f   : > { %v4345_v26 = vpop.f32.mrf.mxu1  ;;  %vm2737_vm3 = vmand %vm2729_vm1, %vm2733_vm2 }
 0x610   : > { %2783 = vmatpush.msrb.mxu2 %v2694_v36  ;;  %v2698_v38 = vmax.f32 %v4345_v26, 0.0  ;;  %v2741_v36 = vcvt.s32.f32 %v2725_v44 }
 0x612   : > { %2784 = vmatpush.msrb.mxu2 %v2693_v15  ;;  %v3400_v15 = vld [vmem:[%s4454_s6 + $0x30] sm:$0xff] }
 0x614   : > { %2785 = vmatpush.msrb.mxu2 %v2692_v13  ;;  %v3399_v13 = vld [vmem:[%s4454_s6 + $0x28] sm:$0xff] }
 0x615   : > { %v4352_v33 = vpop.permute.xlu1 %2749 }
 0x616   : > { %2786 = vmatpush.msrb.mxu2 %v2691_v24  ;;  %vm2754_vm10 = vcmp.lt.f32.partialorder %v2740_v4, %v4352_v33  ;;  %vm2755_vm4 = vcmp.lt.f32.partialorder %v2741_v36, %v4352_v33  ;;  %v3398_v24 = vld [vmem:[%s4454_s6 + $0x20] sm:$0xff] }
 0x617   : > { %v4349_v48 = vpop.f32.mrf.mxu1  ;;  %vm2758_vm11 = vmand %vm2736_vm9, %vm2754_vm10 }
 0x618   : > { %2787 = vmatpush.msrb.mxu2 %v2690_v61  ;;  %v2699_v51 = vmax.f32 %v4349_v48, 0.0  ;;  %vm2759_vm5 = vmand %vm2737_vm3, %vm2755_vm4  ;;  %v3397_v61 = vld [vmem:[%s4454_s6 + $0x18] sm:$0xff] }
 0x619   : > { %v2769_v11 = vpop.permute.xlu0 %2768 }
 0x61a   : > { %2788 = vmatpush.msrb.mxu2 %v2689_v32  ;;  %v3396_v32 = vld [vmem:[%s4454_s6 + $0x10] sm:$0xff] }
 0x61c   : > { %2789 = vmatpush.msrb.mxu2 %v2688_v28  ;;  %v3395_v28 = vld [vmem:[%s4454_s6 + $0x8] sm:$0xff] }
 0x61e   : > { %2790 = vmatpush.msrb.mxu2 %v2687_v43  ;;  %v3394_v43 = vld [vmem:[%s4454_s6] sm:$0xff] }
 0x61f   : > { %v2647_v54 = vpop.f32.mrf.mxu1 }
 0x620   : > { %2791 = vmatpush.msrb.mxu2 %v2686_v20  ;;  %v2700_v14 = vmax.f32 %v2647_v54, 0.0 }
 0x622   : > { %2792 = vmatpush.msrb.mxu2 %v2685_v42 }
 0x624   : > { %2793 = vmatpush.msrb.mxu2 %v2684_v12 }
 0x626   : > { %2794 = vmatpush.msrb.mxu2 %v2683_v17 }
 0x627   : > { %v2649_v55 = vpop.f32.mrf.mxu1 }
 0x628   : > { %2795 = vmatpush.msrb.mxu2 %v2682_v49  ;;  %v2701_v29 = vmax.f32 %v2649_v55, 0.0 }
 0x629   : > { %3314 = vmatmul.msk.f32.vlgmr.msrb.gmra.mxu2 %vm2756_vm6, %v2769_v11 }
 0x62f   : > { %v2652_v25 = vpop.f32.mrf.mxu1 }
 0x630   : > { %v2702_v9 = vmax.f32 %v2652_v25, 0.0 }
 0x637   : > { %v2654_v30 = vpop.f32.mrf.mxu1 }
 0x638   : > { %v2703_v58 = vmax.f32 %v2654_v30, 0.0 }
 0x645   : > { %v4343_v45 = vpop.f32.mrf.mxu2 }
 0x646   : > { %v2704_v27 = vmax.f32 %v4343_v45, 0.0 }
 0x64d   : > { %v2659_v62 = vpop.f32.mrf.mxu2 }
 0x64e   : > { %v2705_v63 = vmax.f32 %v2659_v62, 0.0 }
 0x655   : > { %v2662_v31 = vpop.f32.mrf.mxu2 }
 0x656   : > { %v2706_v0 = vmax.f32 %v2662_v31, 0.0 }
 0x65d   : > { %v2664_v7 = vpop.f32.mrf.mxu2 }
 0x65e   : > { %v2707_v35 = vmax.f32 %v2664_v7, 0.0 }
 0x665   : > { %v2667_v19 = vpop.f32.mrf.mxu2 }
 0x666   : > { %v2708_v5 = vmax.f32 %v2667_v19, 0.0 }
 0x66d   : > { %v2669_v53 = vpop.f32.mrf.mxu2 }
 0x66e   : > { %v2709_v39 = vmax.f32 %v2669_v53, 0.0 }
 0x66f   : > { %v2774_v23 = vpop.permute.xlu1 %2773 }
 0x670   : > { %3315 = vmatmul.msk.f32.gmra.mxu2 %vm2758_vm11, %v2774_v23 }
 0x675   : > { %v2672_v1 = vpop.f32.mrf.mxu2 }
 0x676   : > { %v2710_v21 = vmax.f32 %v2672_v1, 0.0 }
 0x67d   : > { %v2674_v34 = vpop.f32.mrf.mxu2 }
 0x67e   : > { %v2711_v6 = vmax.f32 %v2674_v34, 0.0 }
 0x685   : > { %v2677_v57 = vpop.f32.mrf.mxu2 }
 0x686   : > { %v2712_v3 = vmax.f32 %v2677_v57, 0.0 }
 0x68d   : > { %v2679_v47 = vpop.f32.mrf.mxu2 }
 0x68e   : > { %v2713_v22 = vmax.f32 %v2679_v47, 0.0 }
 0x690   : > { %2803 = vmatpush.msra.mxu2 %v2713_v22 }
 0x692   : > { %2804 = vmatpush.msra.mxu2 %v2712_v3 }
 0x694   : > { %2805 = vmatpush.msra.mxu2 %v2711_v6 }
 0x696   : > { %2806 = vmatpush.msra.mxu2 %v2710_v21 }
 0x698   : > { %2807 = vmatpush.msra.mxu2 %v2709_v39 }
 0x69a   : > { %2808 = vmatpush.msra.mxu2 %v2708_v5 }
 0x69c   : > { %2809 = vmatpush.msra.mxu2 %v2707_v35 }
 0x69e   : > { %2810 = vmatpush.msra.mxu2 %v2706_v0 }
 0x6a0   : > { %2811 = vmatpush.msra.mxu2 %v2705_v63 }
 0x6a2   : > { %2812 = vmatpush.msra.mxu2 %v2704_v27 }
 0x6a4   : > { %2813 = vmatpush.msra.mxu2 %v2703_v58 }
 0x6a6   : > { %2814 = vmatpush.msra.mxu2 %v2702_v9 }
 0x6a8   : > { %2815 = vmatpush.msra.mxu2 %v2701_v29 }
 0x6aa   : > { %2816 = vmatpush.msra.mxu2 %v2700_v14 }
 0x6ac   : > { %2817 = vmatpush.msra.mxu2 %v2699_v51  ;;  %v2797_v20 = vpop.f32.mrf.mxu2 }
 0x6ae   : > { %2818 = vmatpush.msra.mxu2 %v2698_v38 }
 0x6af   : > { %3316 = vmatmul.msk.f32.vlgmr.msra.gmra.mxu2 %vm2757_vm0, %v2769_v11 }
 0x6b0   : > { %2878 = vmatpush.bf16.msrb.mxu2 %v3401_v46 }
 0x6b4   : > { %2879 = vmatpush.bf16.msrb.mxu2 %v3400_v15 }
 0x6b7   : > { %3317 = vmatmul.msk.f32.gmra.mxu2 %vm2759_vm5, %v2774_v23 }
 0x6b8   : > { %2880 = vmatpush.bf16.msrb.mxu2 %v3399_v13 }
 0x6bc   : > { %2881 = vmatpush.bf16.msrb.mxu2 %v3398_v24 }
 0x6c0   : > { %2882 = vmatpush.bf16.msrb.mxu2 %v3397_v61 }
 0x6c4   : > { %2883 = vmatpush.bf16.msrb.mxu2 %v3396_v32 }
 0x6c8   : > { %2884 = vmatpush.bf16.msrb.mxu2 %v3395_v28 }
 0x6cc   : > { %2885 = vmatpush.bf16.msrb.mxu2 %v3394_v43 }
 0x6f3   : > { %v2800_v42 = vpop.f32.mrf.mxu2 }
 0x732   : > { %v2820_v12 = vpop.f32.mrf.mxu2 }
 0x733   : > { %v2821_v17 = vadd.f32 %v2820_v12, %v2797_v20 }
 0x735   : > { %2894 = vst [vmem:[%s370_s22] sm:$0xff] %v2821_v17 }
 0x73a   : > { %v2823_v49 = vpop.f32.mrf.mxu2 }
 0x73b   : > { %v2824_v45 = vadd.f32 %v2823_v49, %v2800_v42 }
 0x73d   : > { %v2826_v62 = vpack.c.bf16 %v2824_v45, %v2821_v17  ;;  %2895 = vst [vmem:[%s370_s22 + $0x8] sm:$0xff] %v2824_v45 }
 0x73f   : > { %2886 = vmatmul.bf16.vlgmr.msrb.gmra.mxu2 %v2826_v62 }
 0x740   : > { %3499 = shalt.err (!%p3496_p7)
}
 0x741   : > { %s3569_s25 = smov 128   ;;  %s3570_s26 = smov 8   ;;  %v3467_v31 = vld [vmem:[%s4455_s7] ss:$0 sm:$0xff] }
 0x742   : > { %3419 = dma.vmem_to_hbm [thread:$0]  (%p3659_p5), %s2932_s24, 256, %s2934_s28, %s2902_s13, %s3569_s25, %s3569_s25, %s3570_s26  }
 0x743   : > { %s4615_s0 = sshll.u32 %s4385_s17, 4  ;;  %s2913_s16 = scalar_lea.hbm %s4456_s8, %s3719_s14 }
 0x744   : > { %s363_s1 = scalar_lea.vmem [#allocation2], %s4615_s0  ;;  %s2916_s2 = sshll.u32 %s2913_s16, 4  ;;  %s2917_s2 = int_to_ptr.hbm [resolvable:$true] %s2916_s2 }
 0x745   : > { %s2914_s22 = sshll.u32 %s363_s1, 4  ;;  %s2897_s24 = scalar_lea.sflag [#allocation3], %s4385_s17  ;;  %s2915_s22 = int_to_ptr.vmem [resolvable:$true] %s2914_s22 }
 0x746   : > { %s3514_s28 = sshra.s32 %s2917_s2, 4  ;;  %s3520_s0 = scalar_lea.hbm %s4456_s8, 32  ;;  %s3515_s28 = int_to_ptr.hbm [resolvable:$true] %s3514_s28 }
 0x747   : > { %s3516_s13 = scalar_lea.hbm %s3515_s28, 16  ;;  %p3521_p11 = scmp.lt.s32.totalorder %s3515_s28, %s4456_s8 }
 0x748   : > { %p3517_p8 = scmp.ne.s32.totalorder %s3515_s28, %s3516_s13  ;;  %p3522_p12 = scmp.lt.s32.totalorder %s3520_s0, %s3516_s13 }
 0x74a   : > { %p3518_p9 = pnand %p3517_p8, %p3659_p5  ;;  %p3523_p13 = por %p3522_p12, %p3521_p11 }
 0x74c   : > { %p3519_p10 = pneg %p3518_p9 }
 0x74e   : > { %p3524_p0 = pnand %p3523_p13, %p3519_p10 }
 0x7c2   : > { %v2887_v7 = vpop.f32.mrf.mxu2 }
 0x7c3   : > { %v2888_v19 = vadd.f32 %v3467_v31, %v2887_v7 }
 0x7c5   : > { %2892 = vst [vmem:[%s363_s1] sm:$0xff] %v2888_v19 }
 0x7ca   : > { %v2889_v26 = vpop.f32.mrf.mxu2 }
 0x7cb   : > { %v2890_v41 = vadd.f32 %v3467_v31, %v2889_v26 }
 0x7cd   : > { %2893 = vst [vmem:[%s363_s1 + $0x8] sm:$0xff] %v2890_v41 }
 0x7ce   : > { %3527 = shalt.err (!%p3524_p0)
}
 0x7cf   : > { %3418 = dma.vmem_to_hbm [thread:$0]  (%p3659_p5), %s2915_s22, 256, %s2917_s2, %s2897_s24, %s3569_s25, %s3569_s25, %s3570_s26  }
 0x7d0 PF: > { %p3429_p1 = scmp.ge.s32.totalorder %s3566_s12, 2  ;;  %s2948_s17 = sand.u32 1, %s3554_s30  }
 0x7d1   : > { %s2949_s1 = scalar_lea.sflag [#allocation3], %s2948_s17 }
 0x7d2   : > { %p3423_p2 = pnand %p3429_p1, %p3663_p6 }
 0x7d4   : > { %p3424_p3 = pneg %p3423_p2 }
 0x7d6   : > { %3545 = dma.done.wait (%p3424_p3), %s2949_s1, 256  }
 0x7d7   : > { %3547 = vsyncadd (%p3424_p3), %s2949_s1, 4294967040  ;;  %s2959_s23 = scalar_lea.sflag [#allocation5], %s2948_s17 }
 0x7d8   : > { %3549 = dma.done.wait (%p3424_p3), %s2959_s23, 256  }
 0x7d9   : > { %3551 = vsyncadd (%p3424_p3), %s2959_s23, 4294967040  ;;  %p23_p5 = scmp.ge.s32.totalorder %s3646_s15, 4   ;;  %s4616_s30 = smov %s3558_s10 }
 0x7da   : > { %s4617_s10 = smov %s3562_s11  ;;  %s4618_s11 = smov %s3657_s18 }
 0x7db   : > { %s4619_s12 = smov %s3646_s15  ;;  %25 = sbr.rel (!%p23_p5) target bundleno = 9 (0x9), region = 110 }
 0x7e0   :  { %2965 = vsyncpa [#allocation3], 1 }
 0x7e1   :  { %2967 = vsyncpa [#allocation3 + $0x1], 1 }
 0x7e2   :  { %2968 = vsyncpa [#allocation5], 1 }
 0x7e3   :  { %2970 = vsyncpa [#allocation5 + $0x1], 1 }

</bundles_post_ra>
